<compile_context>
chip_gen: v7x
topology: tpu7x:2x2x1
jax: 0.10.0
libtpu: 0.0.40
codegen_flags: <defaults>
</compile_context>

<pallas_src>
import jax
import jax.numpy as jnp
from jax.experimental import pallas as pl
from jax.experimental.pallas import tpu as pltpu


def _repblock_kernel(x_ref, w_ref, b_ref, o_ref, xpad_ref):
    # x_ref   : (nb, H, W, Cin)       bf16 activation block (unpadded)
    # w_ref   : (3, 3, Cin, Cp)       bf16 BN-folded + (3x3 <- +1x1) weights
    # b_ref   : (1, Cp)               f32 merged bias
    # o_ref   : (nb, H, W, Cp)        f32 output block (Cp = Cout padded to 128k)
    # xpad_ref: (nb, H+2, W+2, Cin)   f32 VMEM scratch holding the padded tile
    nb, H, W, Cp = o_ref.shape
    Cin = x_ref.shape[-1]

    # Build the zero-padded tile in VMEM (replaces wrapper-side jnp.pad, which
    # would roughly triple the HBM traffic for x).  Re-zeroed every grid step
    # so the halo stays correct under megacore sharding of the parallel axis.
    xpad_ref[...] = jnp.zeros_like(xpad_ref)
    xpad_ref[:, 1:H + 1, 1:W + 1, :] = x_ref[...].astype(jnp.float32)
    xp = xpad_ref[...]                                   # (nb, H+2, W+2, Cin)

    # 3x3 conv as 9 accumulated matmuls over the taps.  Operands are cast to
    # bf16 for the MXU; accumulation stays in f32.  For realistic RepVGG
    # channel counts K = Cin is already MXU-friendly (the im2col K=9*Cin
    # variant only helps tiny Cin and needs minor-dim relayout).
    # TODO(synk): add a row-tiling grid axis (with a 1-row halo) for large
    # images so per-step blocks stay inside the 32 MiB scoped VMEM on v7x.
    acc = jnp.zeros((nb * H * W, Cp), dtype=jnp.float32)
    for kh in range(3):
        for kw in range(3):
            patch = xp[:, kh:kh + H, kw:kw + W, :].reshape(nb * H * W, Cin)
            acc = acc + jnp.dot(patch.astype(jnp.bfloat16), w_ref[kh, kw],
                                preferred_element_type=jnp.float32)

    # Epilogue in f32: merged bias + ReLU (BN affines and the 1x1 branch were
    # folded into w/b in the wrapper), then a lane-dense store.
    out = jnp.maximum(acc + b_ref[...], 0.0)
    o_ref[...] = out.reshape(nb, H, W, Cp).astype(o_ref.dtype)


def rep_block_forward(x_nhwc, params, *, stride=1):
    """x_nhwc: (N, H, W, Cin) float32.  Returns (N, H, W, Cout) float32."""
    assert stride == 1, "only stride=1 implemented in the Pallas kernel"
    N, H, W, Cin = x_nhwc.shape
    w33 = params["w33"]                                  # (3, 3, Cin, Cout)
    w11 = params["w11"]                                  # (Cin, Cout)
    Cout = w33.shape[-1]
    eps = 1e-5

    # --- RepVGG reparameterization (valid in inference mode with frozen BN) ---
    s33 = params["g33"] / jnp.sqrt(params["v33"] + eps)
    b33 = params["be33"] - params["m33"] * s33
    s11 = params["g11"] / jnp.sqrt(params["v11"] + eps)
    b11 = params["be11"] - params["m11"] * s11

    w_fused = w33 * s33[None, None, None, :]             # fold BN33 scale
    w_fused = w_fused.at[1, 1].add(w11 * s11[None, :])   # 1x1 into centre tap
    bias = b33 + b11                                     # merged bias

    # Pad Cout to a lane-dense multiple of 128 (zero columns; stripped later).
    Cp = ((Cout + 127) // 128) * 128
    if Cp != Cout:
        w_fused = jnp.pad(w_fused, ((0, 0), (0, 0), (0, 0), (0, Cp - Cout)))
        bias = jnp.pad(bias, (0, Cp - Cout))

    w_bf16 = w_fused.astype(jnp.bfloat16)                # (3, 3, Cin, Cp)
    bias = bias.reshape(1, Cp).astype(jnp.float32)
    x_bf16 = x_nhwc.astype(jnp.bfloat16)                 # halve HBM bytes for x

    # Batch-block size: largest nb dividing N that still leaves >=2 grid steps
    # (so both TensorCores get work on v7x); N=1 falls back to nb=1.
    nb = 1
    for cand in range(min(N, 8), 0, -1):
        if N % cand == 0 and N // cand >= 2:
            nb = cand
            break

    Hp, Wp = H + 2, W + 2
    out = pl.pallas_call(
        _repblock_kernel,
        out_shape=jax.ShapeDtypeStruct((N, H, W, Cp), jnp.float32),
        grid_spec=pltpu.PrefetchScalarGridSpec(
            num_scalar_prefetch=0,
            grid=(N // nb,),
            in_specs=[
                pl.BlockSpec((nb, H, W, Cin), lambda n: (n, 0, 0, 0)),
                pl.BlockSpec((3, 3, Cin, Cp), lambda n: (0, 0, 0, 0)),
                pl.BlockSpec((1, Cp), lambda n: (0, 0)),
            ],
            out_specs=pl.BlockSpec((nb, H, W, Cp), lambda n: (n, 0, 0, 0)),
            scratch_shapes=[pltpu.VMEM((nb, Hp, Wp, Cin), jnp.float32)],
        ),
        compiler_params=pltpu.CompilerParams(
            dimension_semantics=("parallel",)),
    )(x_bf16, w_bf16, bias)

    return out[..., :Cout]


def reference_forward(x_nhwc, params):
    """Pure-JAX f32 reference (matches the PyTorch module semantics)."""
    eps = 1e-5

    def conv(x, w, ksize):
        pad = (ksize - 1) // 2
        return jax.lax.conv_general_dilated(
            x, w, window_strides=(1, 1),
            padding=[(pad, pad), (pad, pad)],
            dimension_numbers=("NHWC", "HWIO", "NHWC"))

    def bn(x, gamma, beta, mean, var):
        return (x - mean) / jnp.sqrt(var + eps) * gamma + beta

    o33 = bn(conv(x_nhwc, params["w33"], 3),
             params["g33"], params["be33"], params["m33"], params["v33"])
    o11 = bn(conv(x_nhwc, params["w11"][None, None], 1),
             params["g11"], params["be11"], params["m11"], params["v11"])
    return jnp.maximum(o33 + o11, 0.0)


def make_params(key, in_planes, out_planes):
    ks = jax.random.split(key, 10)
    return {
        "w33": 0.1 * jax.random.normal(ks[0], (3, 3, in_planes, out_planes),
                                       jnp.float32),
        "w11": 0.1 * jax.random.normal(ks[1], (in_planes, out_planes),
                                       jnp.float32),
        "g33": 1.0 + 0.1 * jax.random.normal(ks[2], (out_planes,), jnp.float32),
        "be33": 0.1 * jax.random.normal(ks[3], (out_planes,), jnp.float32),
        "m33": 0.1 * jax.random.normal(ks[4], (out_planes,), jnp.float32),
        "v33": jnp.abs(jax.random.normal(ks[5], (out_planes,), jnp.float32)) + 0.5,
        "g11": 1.0 + 0.1 * jax.random.normal(ks[6], (out_planes,), jnp.float32),
        "be11": 0.1 * jax.random.normal(ks[7], (out_planes,), jnp.float32),
        "m11": 0.1 * jax.random.normal(ks[8], (out_planes,), jnp.float32),
        "v11": jnp.abs(jax.random.normal(ks[9], (out_planes,), jnp.float32)) + 0.5,
    }


if __name__ == "__main__":
    key = jax.random.PRNGKey(0)
    kx, kp = jax.random.split(key)

    N, Cin, Cout, H, W = 2, 4, 8, 16, 16
    # PyTorch input would be NCHW (2, 4, 16, 16); we use NHWC internally.
    x_nchw = jax.random.normal(kx, (N, Cin, H, W), jnp.float32)
    x_nhwc = jnp.transpose(x_nchw, (0, 2, 3, 1))

    params = make_params(kp, Cin, Cout)

    out = rep_block_forward(x_nhwc, params, stride=1)
    out = jax.block_until_ready(out)

    ref = reference_forward(x_nhwc, params)
    assert out.shape == (N, H, W, Cout)
    # bf16 MXU operands + BN/branch folding -> compare against the f32
    # reference with a loose-but-meaningful tolerance (outputs are O(1)).
    max_err = float(jnp.max(jnp.abs(out - ref)))
    assert jnp.allclose(out, ref, atol=1e-1, rtol=1e-1), max_err

    print("KERNEL_OK")
</pallas_src>

<mosaic_0001>
module attributes {stable_mosaic.version = 11 : i64} {
  func.func @_repblock_kernel(%arg0: i32, %arg1: memref<1x16x16x4xbf16, #tpu.memory_space<vmem>>, %arg2: memref<3x3x4x128xbf16, #tpu.memory_space<vmem>>, %arg3: memref<1x128xf32, #tpu.memory_space<vmem>>, %arg4: memref<1x16x16x128xf32, #tpu.memory_space<vmem>>, %arg5: memref<1x18x18x4xf32, #tpu.memory_space<vmem>>) attributes {dimension_semantics = [#tpu.dimension_semantics<parallel>], iteration_bounds = array<i64: 2>, scalar_prefetch = 0 : i64, scratch_operands = 1 : i64, tpu.core_type = #tpu.core_type<tc>, window_params = [{transform_indices = @transform_0, window_bounds = array<i64: 1, 16, 16, 4>}, {pipeline_mode = #tpu.pipeline_mode<synchronous>, transform_indices = @transform_1, window_bounds = array<i64: 3, 3, 4, 128>}, {pipeline_mode = #tpu.pipeline_mode<synchronous>, transform_indices = @transform_2, window_bounds = array<i64: 1, 128>}, {transform_indices = @transform_3, window_bounds = array<i64: 1, 16, 16, 128>}]} {
    %cst = arith.constant 0.000000e+00 : f32
    %0 = vector.broadcast %cst : f32 to vector<1x18x18x4xf32>
    %c0 = arith.constant 0 : index
    %c0_0 = arith.constant 0 : index
    %c0_1 = arith.constant 0 : index
    %c0_2 = arith.constant 0 : index
    %1 = vector.load %arg5[%c0, %c0_0, %c0_1, %c0_2] : memref<1x18x18x4xf32, #tpu.memory_space<vmem>>, vector<1x18x18x4xf32>
    tpu.vector_store %arg5[%c0, %c0_0, %c0_1, %c0_2], %0 {strides = array<i32>} : memref<1x18x18x4xf32, #tpu.memory_space<vmem>>, vector<1x18x18x4xf32>,
    %c0_3 = arith.constant 0 : index
    %c0_4 = arith.constant 0 : index
    %c0_5 = arith.constant 0 : index
    %c0_6 = arith.constant 0 : index
    %2 = vector.load %arg1[%c0_3, %c0_4, %c0_5, %c0_6] : memref<1x16x16x4xbf16, #tpu.memory_space<vmem>>, vector<1x16x16x4xbf16>
    %3 = arith.extf %2 : vector<1x16x16x4xbf16> to vector<1x16x16x4xf32>
    %c0_7 = arith.constant 0 : index
    %c1 = arith.constant 1 : index
    %c1_8 = arith.constant 1 : index
    %c0_9 = arith.constant 0 : index
    %4 = vector.load %arg5[%c0_7, %c1, %c1_8, %c0_9] : memref<1x18x18x4xf32, #tpu.memory_space<vmem>>, vector<1x16x16x4xf32>
    tpu.vector_store %arg5[%c0_7, %c1, %c1_8, %c0_9], %3 {strides = array<i32>} : memref<1x18x18x4xf32, #tpu.memory_space<vmem>>, vector<1x16x16x4xf32>,
    %c0_10 = arith.constant 0 : index
    %c0_11 = arith.constant 0 : index
    %c0_12 = arith.constant 0 : index
    %c0_13 = arith.constant 0 : index
    %5 = vector.load %arg5[%c0_10, %c0_11, %c0_12, %c0_13] : memref<1x18x18x4xf32, #tpu.memory_space<vmem>>, vector<1x18x18x4xf32>
    %cst_14 = arith.constant 0.000000e+00 : f32
    %6 = vector.broadcast %cst_14 : f32 to vector<256x128xf32>
    %7 = vector.extract_strided_slice %5 {offsets = [0, 0, 0, 0], sizes = [1, 16, 16, 4], strides = [1, 1, 1, 1]} : vector<1x18x18x4xf32> to vector<1x16x16x4xf32>
    %8 = vector.shape_cast %7 : vector<1x16x16x4xf32> to vector<256x4xf32>
    %9 = arith.truncf %8 : vector<256x4xf32> to vector<256x4xbf16>
    %c0_15 = arith.constant 0 : index
    %c0_16 = arith.constant 0 : index
    %c0_17 = arith.constant 0 : index
    %c0_18 = arith.constant 0 : index
    %10 = vector.load %arg2[%c0_15, %c0_16, %c0_17, %c0_18] : memref<3x3x4x128xbf16, #tpu.memory_space<vmem>>, vector<1x1x4x128xbf16>
    %11 = vector.shape_cast %10 : vector<1x1x4x128xbf16> to vector<4x128xbf16>
    %cst_19 = arith.constant dense<0.000000e+00> : vector<256x128xf32>
    %12 = tpu.matmul %9, %11, %cst_19 {dimension_numbers = #tpu.dot_dimension_numbers<[1], [0], [0], [1], [0, 0, 1, 1], [], []>} : vector<256x4xbf16>, vector<4x128xbf16>, vector<256x128xf32> -> vector<256x128xf32>
    %13 = arith.addf %6, %12 : vector<256x128xf32>
    %14 = vector.extract_strided_slice %5 {offsets = [0, 0, 1, 0], sizes = [1, 16, 16, 4], strides = [1, 1, 1, 1]} : vector<1x18x18x4xf32> to vector<1x16x16x4xf32>
    %15 = vector.shape_cast %14 : vector<1x16x16x4xf32> to vector<256x4xf32>
    %16 = arith.truncf %15 : vector<256x4xf32> to vector<256x4xbf16>
    %c0_20 = arith.constant 0 : index
    %c1_21 = arith.constant 1 : index
    %c0_22 = arith.constant 0 : index
    %c0_23 = arith.constant 0 : index
    %17 = vector.load %arg2[%c0_20, %c1_21, %c0_22, %c0_23] : memref<3x3x4x128xbf16, #tpu.memory_space<vmem>>, vector<1x1x4x128xbf16>
    %18 = vector.shape_cast %17 : vector<1x1x4x128xbf16> to vector<4x128xbf16>
    %cst_24 = arith.constant dense<0.000000e+00> : vector<256x128xf32>
    %19 = tpu.matmul %16, %18, %cst_24 {dimension_numbers = #tpu.dot_dimension_numbers<[1], [0], [0], [1], [0, 0, 1, 1], [], []>} : vector<256x4xbf16>, vector<4x128xbf16>, vector<256x128xf32> -> vector<256x128xf32>
    %20 = arith.addf %13, %19 : vector<256x128xf32>
    %21 = vector.extract_strided_slice %5 {offsets = [0, 0, 2, 0], sizes = [1, 16, 16, 4], strides = [1, 1, 1, 1]} : vector<1x18x18x4xf32> to vector<1x16x16x4xf32>
    %22 = vector.shape_cast %21 : vector<1x16x16x4xf32> to vector<256x4xf32>
    %23 = arith.truncf %22 : vector<256x4xf32> to vector<256x4xbf16>
    %c0_25 = arith.constant 0 : index
    %c2 = arith.constant 2 : index
    %c0_26 = arith.constant 0 : index
    %c0_27 = arith.constant 0 : index
    %24 = vector.load %arg2[%c0_25, %c2, %c0_26, %c0_27] : memref<3x3x4x128xbf16, #tpu.memory_space<vmem>>, vector<1x1x4x128xbf16>
    %25 = vector.shape_cast %24 : vector<1x1x4x128xbf16> to vector<4x128xbf16>
    %cst_28 = arith.constant dense<0.000000e+00> : vector<256x128xf32>
    %26 = tpu.matmul %23, %25, %cst_28 {dimension_numbers = #tpu.dot_dimension_numbers<[1], [0], [0], [1], [0, 0, 1, 1], [], []>} : vector<256x4xbf16>, vector<4x128xbf16>, vector<256x128xf32> -> vector<256x128xf32>
    %27 = arith.addf %20, %26 : vector<256x128xf32>
    %28 = vector.extract_strided_slice %5 {offsets = [0, 1, 0, 0], sizes = [1, 16, 16, 4], strides = [1, 1, 1, 1]} : vector<1x18x18x4xf32> to vector<1x16x16x4xf32>
    %29 = vector.shape_cast %28 : vector<1x16x16x4xf32> to vector<256x4xf32>
    %30 = arith.truncf %29 : vector<256x4xf32> to vector<256x4xbf16>
    %c1_29 = arith.constant 1 : index
    %c0_30 = arith.constant 0 : index
    %c0_31 = arith.constant 0 : index
    %c0_32 = arith.constant 0 : index
    %31 = vector.load %arg2[%c1_29, %c0_30, %c0_31, %c0_32] : memref<3x3x4x128xbf16, #tpu.memory_space<vmem>>, vector<1x1x4x128xbf16>
    %32 = vector.shape_cast %31 : vector<1x1x4x128xbf16> to vector<4x128xbf16>
    %cst_33 = arith.constant dense<0.000000e+00> : vector<256x128xf32>
    %33 = tpu.matmul %30, %32, %cst_33 {dimension_numbers = #tpu.dot_dimension_numbers<[1], [0], [0], [1], [0, 0, 1, 1], [], []>} : vector<256x4xbf16>, vector<4x128xbf16>, vector<256x128xf32> -> vector<256x128xf32>
    %34 = arith.addf %27, %33 : vector<256x128xf32>
    %35 = vector.extract_strided_slice %5 {offsets = [0, 1, 1, 0], sizes = [1, 16, 16, 4], strides = [1, 1, 1, 1]} : vector<1x18x18x4xf32> to vector<1x16x16x4xf32>
    %36 = vector.shape_cast %35 : vector<1x16x16x4xf32> to vector<256x4xf32>
    %37 = arith.truncf %36 : vector<256x4xf32> to vector<256x4xbf16>
    %c1_34 = arith.constant 1 : index
    %c1_35 = arith.constant 1 : index
    %c0_36 = arith.constant 0 : index
    %c0_37 = arith.constant 0 : index
    %38 = vector.load %arg2[%c1_34, %c1_35, %c0_36, %c0_37] : memref<3x3x4x128xbf16, #tpu.memory_space<vmem>>, vector<1x1x4x128xbf16>
    %39 = vector.shape_cast %38 : vector<1x1x4x128xbf16> to vector<4x128xbf16>
    %cst_38 = arith.constant dense<0.000000e+00> : vector<256x128xf32>
    %40 = tpu.matmul %37, %39, %cst_38 {dimension_numbers = #tpu.dot_dimension_numbers<[1], [0], [0], [1], [0, 0, 1, 1], [], []>} : vector<256x4xbf16>, vector<4x128xbf16>, vector<256x128xf32> -> vector<256x128xf32>
    %41 = arith.addf %34, %40 : vector<256x128xf32>
    %42 = vector.extract_strided_slice %5 {offsets = [0, 1, 2, 0], sizes = [1, 16, 16, 4], strides = [1, 1, 1, 1]} : vector<1x18x18x4xf32> to vector<1x16x16x4xf32>
    %43 = vector.shape_cast %42 : vector<1x16x16x4xf32> to vector<256x4xf32>
    %44 = arith.truncf %43 : vector<256x4xf32> to vector<256x4xbf16>
    %c1_39 = arith.constant 1 : index
    %c2_40 = arith.constant 2 : index
    %c0_41 = arith.constant 0 : index
    %c0_42 = arith.constant 0 : index
    %45 = vector.load %arg2[%c1_39, %c2_40, %c0_41, %c0_42] : memref<3x3x4x128xbf16, #tpu.memory_space<vmem>>, vector<1x1x4x128xbf16>
    %46 = vector.shape_cast %45 : vector<1x1x4x128xbf16> to vector<4x128xbf16>
    %cst_43 = arith.constant dense<0.000000e+00> : vector<256x128xf32>
    %47 = tpu.matmul %44, %46, %cst_43 {dimension_numbers = #tpu.dot_dimension_numbers<[1], [0], [0], [1], [0, 0, 1, 1], [], []>} : vector<256x4xbf16>, vector<4x128xbf16>, vector<256x128xf32> -> vector<256x128xf32>
    %48 = arith.addf %41, %47 : vector<256x128xf32>
    %49 = vector.extract_strided_slice %5 {offsets = [0, 2, 0, 0], sizes = [1, 16, 16, 4], strides = [1, 1, 1, 1]} : vector<1x18x18x4xf32> to vector<1x16x16x4xf32>
    %50 = vector.shape_cast %49 : vector<1x16x16x4xf32> to vector<256x4xf32>
    %51 = arith.truncf %50 : vector<256x4xf32> to vector<256x4xbf16>
    %c2_44 = arith.constant 2 : index
    %c0_45 = arith.constant 0 : index
    %c0_46 = arith.constant 0 : index
    %c0_47 = arith.constant 0 : index
    %52 = vector.load %arg2[%c2_44, %c0_45, %c0_46, %c0_47] : memref<3x3x4x128xbf16, #tpu.memory_space<vmem>>, vector<1x1x4x128xbf16>
    %53 = vector.shape_cast %52 : vector<1x1x4x128xbf16> to vector<4x128xbf16>
    %cst_48 = arith.constant dense<0.000000e+00> : vector<256x128xf32>
    %54 = tpu.matmul %51, %53, %cst_48 {dimension_numbers = #tpu.dot_dimension_numbers<[1], [0], [0], [1], [0, 0, 1, 1], [], []>} : vector<256x4xbf16>, vector<4x128xbf16>, vector<256x128xf32> -> vector<256x128xf32>
    %55 = arith.addf %48, %54 : vector<256x128xf32>
    %56 = vector.extract_strided_slice %5 {offsets = [0, 2, 1, 0], sizes = [1, 16, 16, 4], strides = [1, 1, 1, 1]} : vector<1x18x18x4xf32> to vector<1x16x16x4xf32>
    %57 = vector.shape_cast %56 : vector<1x16x16x4xf32> to vector<256x4xf32>
    %58 = arith.truncf %57 : vector<256x4xf32> to vector<256x4xbf16>
    %c2_49 = arith.constant 2 : index
    %c1_50 = arith.constant 1 : index
    %c0_51 = arith.constant 0 : index
    %c0_52 = arith.constant 0 : index
    %59 = vector.load %arg2[%c2_49, %c1_50, %c0_51, %c0_52] : memref<3x3x4x128xbf16, #tpu.memory_space<vmem>>, vector<1x1x4x128xbf16>
    %60 = vector.shape_cast %59 : vector<1x1x4x128xbf16> to vector<4x128xbf16>
    %cst_53 = arith.constant dense<0.000000e+00> : vector<256x128xf32>
    %61 = tpu.matmul %58, %60, %cst_53 {dimension_numbers = #tpu.dot_dimension_numbers<[1], [0], [0], [1], [0, 0, 1, 1], [], []>} : vector<256x4xbf16>, vector<4x128xbf16>, vector<256x128xf32> -> vector<256x128xf32>
    %62 = arith.addf %55, %61 : vector<256x128xf32>
    %63 = vector.extract_strided_slice %5 {offsets = [0, 2, 2, 0], sizes = [1, 16, 16, 4], strides = [1, 1, 1, 1]} : vector<1x18x18x4xf32> to vector<1x16x16x4xf32>
    %64 = vector.shape_cast %63 : vector<1x16x16x4xf32> to vector<256x4xf32>
    %65 = arith.truncf %64 : vector<256x4xf32> to vector<256x4xbf16>
    %c2_54 = arith.constant 2 : index
    %c2_55 = arith.constant 2 : index
    %c0_56 = arith.constant 0 : index
    %c0_57 = arith.constant 0 : index
    %66 = vector.load %arg2[%c2_54, %c2_55, %c0_56, %c0_57] : memref<3x3x4x128xbf16, #tpu.memory_space<vmem>>, vector<1x1x4x128xbf16>
    %67 = vector.shape_cast %66 : vector<1x1x4x128xbf16> to vector<4x128xbf16>
    %cst_58 = arith.constant dense<0.000000e+00> : vector<256x128xf32>
    %68 = tpu.matmul %65, %67, %cst_58 {dimension_numbers = #tpu.dot_dimension_numbers<[1], [0], [0], [1], [0, 0, 1, 1], [], []>} : vector<256x4xbf16>, vector<4x128xbf16>, vector<256x128xf32> -> vector<256x128xf32>
    %69 = arith.addf %62, %68 : vector<256x128xf32>
    %c0_59 = arith.constant 0 : index
    %c0_60 = arith.constant 0 : index
    %70 = vector.load %arg3[%c0_59, %c0_60] : memref<1x128xf32, #tpu.memory_space<vmem>>, vector<1x128xf32>
    %71 = vector.broadcast %70 : vector<1x128xf32> to vector<256x128xf32>
    %72 = arith.addf %69, %71 : vector<256x128xf32>
    %cst_61 = arith.constant 0.000000e+00 : f32
    %73 = vector.broadcast %cst_61 : f32 to vector<256x128xf32>
    %74 = arith.maximumf %72, %73 : vector<256x128xf32>
    %75 = vector.shape_cast %74 : vector<256x128xf32> to vector<1x16x16x128xf32>
    %c0_62 = arith.constant 0 : index
    %c0_63 = arith.constant 0 : index
    %c0_64 = arith.constant 0 : index
    %c0_65 = arith.constant 0 : index
    %76 = vector.load %arg4[%c0_62, %c0_63, %c0_64, %c0_65] : memref<1x16x16x128xf32, #tpu.memory_space<vmem>>, vector<1x16x16x128xf32>
    tpu.vector_store %arg4[%c0_62, %c0_63, %c0_64, %c0_65], %75 {strides = array<i32>} : memref<1x16x16x128xf32, #tpu.memory_space<vmem>>, vector<1x16x16x128xf32>,
    return
  }
  func.func @transform_0(%arg0: i32) -> (i32, i32, i32, i32) {
    %c0_i32 = arith.constant 0 : i32
    %c0_i32_0 = arith.constant 0 : i32
    %c0_i32_1 = arith.constant 0 : i32
    %c0_i32_2 = arith.constant 0 : i32
    return %arg0, %c0_i32, %c0_i32_0, %c0_i32_1 : i32, i32, i32, i32
  }
  func.func @transform_1(%arg0: i32) -> (i32, i32, i32, i32) {
    %c0_i32 = arith.constant 0 : i32
    %c0_i32_0 = arith.constant 0 : i32
    %c0_i32_1 = arith.constant 0 : i32
    %c0_i32_2 = arith.constant 0 : i32
    %c0_i32_3 = arith.constant 0 : i32
    return %c0_i32, %c0_i32_0, %c0_i32_1, %c0_i32_2 : i32, i32, i32, i32
  }
  func.func @transform_2(%arg0: i32) -> (i32, i32) {
    %c0_i32 = arith.constant 0 : i32
    %c0_i32_0 = arith.constant 0 : i32
    %c0_i32_1 = arith.constant 0 : i32
    return %c0_i32, %c0_i32_0 : i32, i32
  }
  func.func @transform_3(%arg0: i32) -> (i32, i32, i32, i32) {
    %c0_i32 = arith.constant 0 : i32
    %c0_i32_0 = arith.constant 0 : i32
    %c0_i32_1 = arith.constant 0 : i32
    %c0_i32_2 = arith.constant 0 : i32
    return %arg0, %c0_i32, %c0_i32_0, %c0_i32_1 : i32, i32, i32, i32
  }
}

</mosaic_0001>

<bundles_post_ra>
// kernel: tpu_custom_call.1
= control target key start
LH: loop header
LB: loop body
LE: loop exit
PB: predicated region body
PF: predicated region fallthrough
CT: control target
= control target key end

     0   :  { %8 = vsyncpa [#allocation4], 0  ;;  %s4973_s0 = inlined_call_operand.vmem [shape: bf16[2,16,16,4], index: 0, kind: input, shape index: {}]   ;;  %s4974_s1 = inlined_call_operand.vmem [shape: bf16[3,3,4,128], index: 1, kind: input, shape index: {}]   ;;  %s4975_s2 = inlined_call_operand.vmem [shape: f32[1,128], index: 2, kind: input, shape index: {}]   ;;  %s4976_s3 = inlined_call_operand.hbm [shape: f32[2,16,16,128], index: 3, kind: output, shape index: {}]  }
   0x1   :  { %10 = vsyncpa [#allocation4 + $0x1], 0  ;;  %s3902_s12 = smov 0   ;;  %s3904_s13 = smov 0  }
   0x2   :  { %s3906_s14 = smov 0   ;;  %s3908_s15 = smov 0  }
   0x3 LB: > { %s3923_s16 = sadd.s32 4294967295, %s3876_s15   ;;  %s2798_s17 = sadd.s32 4294967294, %s3876_s15   ;;  %s3876_s15 = sphi %s3908_s15, %s5042_s15   ;;  %s3872_s14 = sphi %s3906_s14, %s5041_s14   ;;  %s3868_s13 = sphi %s3904_s13, %s5040_s13   ;;  %s3864_s12 = sphi %s3902_s12, %s5039_s12  }
   0x4   : > { %s3927_s18 = sadd.s32 1, %s3876_s15   ;;  %s91_s19 = sadd.s32 1, %s3872_s14 }
   0x5   : > { %s88_s20 = ssub.s32 %s3876_s15, %s3927_s18  ;;  %p101_p0 = scmp.ne.s32.totalorder %s3872_s14, %s3868_s13 }
   0x6   : > { %p89_p1 = scmp.eq.s32.totalorder %s88_s20, 0  ;;  %p102_p2 = scmp.eq.s32.totalorder %s3923_s16, 1 }
   0x7   : > { %p107_p3 = scmp.ne.s32.totalorder %s3868_s13, %s3864_s12  ;;  %p108_p4 = scmp.eq.s32.totalorder %s2798_s17, 1 }
   0x8   : > { %s3938_s21 = scalar_select %p89_p1, %s3872_s14, %s91_s19  }
   0x9   : > { %p3940_p5 = por %p102_p2, %p101_p0  ;;  %p3944_p6 = por %p108_p4, %p107_p3 }
   0xa   : > { %p2801_p7 = scmp.ge.s32.totalorder %s3876_s15, 1  ;;  %p140_p8 = scmp.lt.s32.totalorder %s3876_s15, 3 }
   0xc   : > { %p141_p9 = pnand %p2801_p7, %p140_p8 }
   0xe   : > { %144 = sbr.rel (%p141_p9) target bundleno = 582 (0x246), region = 32 }
  0x15   : > { %v2805_v0 = vld [vmem:[%s4974_s1 + $0x2] sm:$0x3]  ;;  %vm621_vm0 = vcmask 1041408   ;;  %v2872_v1 = vld [vmem:[%s4974_s1 + $0x8] sm:$0x3]  ;;  %vm170_vm1 = vcmask 31744  }
  0x16   : > { %3761 = vmatprep.subr.msk.bf16.mxu1 %vm621_vm0, %v2805_v0  ;;  %3765 = vmatprep.subr.msk.bf16.mxu0 %vm621_vm0, %v2872_v1  ;;  %v623_v2 = vsel %vm621_vm0, %v2805_v0, 0  ;;  %v3960_v3 = vsel %vm621_vm0, %v2872_v1, 0  ;;  %vm173_vm2 = vcmask 25600   ;;  %p164_p10 = scmp.lt.s32.totalorder %s3923_s16, 1  ;;  %v3878_v4 = vmov 0.0   ;;  %s161_s4 = sand.u32 1, %s3868_s13  }
  0x17   : > { %5003 = vst [vmem:[#allocation6_spill] sm:$0xff] %v3960_v3  ;;  %3198 = vmatpush3.bf16.msra.mxu1 %v623_v2  ;;  %3334 = vmatpush3.bf16.msra.mxu0 %v3960_v3  ;;  %171 = vst.msk [vmem:[#allocation2] sm:$0xff] %vm170_vm1, %v3878_v4  ;;  %v4021_v5 = vld [vmem:[%s4974_s1] sm:$0x3]  ;;  %v4026_v6 = vld [vmem:[%s4974_s1 + $0xa] sm:$0x3] }
  0x18   : > { %172 = vst.msk [vmem:[#allocation2 + $0x8] sm:$0xff] %vm170_vm1, %v3878_v4  ;;  %175 = vst.msk [vmem:[#allocation2 + $0x18] sm:$0xff] %vm170_vm1, %v3878_v4  ;;  %s165_s5 = scalar_select %p164_p10, %s3923_s16, 1  ;;  %3762 = vmatprep.subr.msk.bf16.mxu1 %vm621_vm0, %v4021_v5  ;;  %3767 = vmatprep.subr.msk.bf16.mxu0 %vm621_vm0, %v4026_v6  ;;  %vm442_vm3 = vcmask 1046528   ;;  %vm998_vm4 = vcmask 1045504  }
  0x19   : > { %174 = vst.msk [vmem:[#allocation2 + $0x10] sm:$0x3] %vm173_vm2, %v3878_v4  ;;  %177 = vst.msk [vmem:[#allocation2 + $0x28] sm:$0x3] %vm173_vm2, %v3878_v4  ;;  %s2802_s7 = sshll.u32 %s161_s4, 8  ;;  %s3879_s24 = smov [#allocation3]  }
  0x1a   : > { %176 = vst.msk [vmem:[#allocation2 + $0x20] sm:$0xff] %vm170_vm1, %v3878_v4  ;;  %178 = vst.msk [vmem:[#allocation2 + $0x30] sm:$0xff] %vm170_vm1, %v3878_v4  ;;  %s2963_s6 = sshll.u32 %s165_s5, 7  ;;  %s4855_s8 = scalar_lea.vmem [#allocation3], %s2802_s7 }
  0x1b   : > { %179 = vst.msk [vmem:[#allocation2 + $0x38] sm:$0xff] %vm170_vm1, %v3878_v4  ;;  %181 = vst.msk [vmem:[#allocation2 + $0x48] sm:$0xff] %vm170_vm1, %v3878_v4  ;;  %s4038_s9 = scalar_lea.vmem %s4973_s0, %s2963_s6  ;;  %s2736_s10 = sshll.u32 %s4855_s8, 4  ;;  %s4925_s10 = int_to_ptr.vmem [resolvable:$true] %s2736_s10 }
  0x1c   : > { %180 = vst.msk [vmem:[#allocation2 + $0x40] sm:$0x3] %vm173_vm2, %v3878_v4  ;;  %183 = vst.msk [vmem:[#allocation2 + $0x58] sm:$0x3] %vm173_vm2, %v3878_v4  ;;  %v2966_v7 = vld [vmem:[%s4038_s9] sm:$0xff]   ;;  %v3029_v8 = vld [vmem:[%s4038_s9 + $0x8] sm:$0xff]  }
  0x1d   : > { %182 = vst.msk [vmem:[#allocation2 + $0x50] sm:$0xff] %vm170_vm1, %v3878_v4  ;;  %184 = vst.msk [vmem:[#allocation2 + $0x60] sm:$0xff] %vm170_vm1, %v3878_v4  ;;  %v3030_v9 = vld [vmem:[%s4038_s9 + $0x10] sm:$0xff]   ;;  %v2967_v10 = vunpack.c.l.bf16 %v2966_v7  ;;  %v2968_v11 = vunpack.c.h.bf16 %v2966_v7  ;;  %v2971_v12 = vunpack.c.l.bf16 %v3029_v8  ;;  %v2972_v13 = vunpack.c.h.bf16 %v3029_v8  ;;  %v3031_v14 = vld [vmem:[%s4038_s9 + $0x18] sm:$0xff]   ;;  %s3814_s20 = scalar_lea.vmem %s4925_s10, 4096  ;;  %s3818_s25 = sshll.u32 %s3879_s24, 4  ;;  %s3819_s25 = int_to_ptr.vmem [resolvable:$false] %s3818_s25 }
  0x1e   : > { %185 = vst.msk [vmem:[#allocation2 + $0x68] sm:$0xff] %vm170_vm1, %v3878_v4  ;;  %187 = vst.msk [vmem:[#allocation2 + $0x78] sm:$0xff] %vm170_vm1, %v3878_v4  ;;  %v3032_v15 = vld [vmem:[%s4038_s9 + $0x20] sm:$0xff]   ;;  %v3033_v16 = vld [vmem:[%s4038_s9 + $0x28] sm:$0xff]   ;;  %v2975_v20 = vunpack.c.l.bf16 %v3030_v9  ;;  %v2976_v21 = vunpack.c.h.bf16 %v3030_v9  ;;  %v2979_v22 = vunpack.c.l.bf16 %v3031_v14  ;;  %v2980_v23 = vunpack.c.h.bf16 %v3031_v14  ;;  %p3815_p11 = scmp.ne.s32.totalorder %s4925_s10, %s3814_s20  ;;  %s3820_s26 = scalar_lea.vmem %s3819_s25, 8192 }
  0x1f   : > { %186 = vst.msk [vmem:[#allocation2 + $0x70] sm:$0x3] %vm173_vm2, %v3878_v4  ;;  %189 = vst.msk [vmem:[#allocation2 + $0x88] sm:$0x3] %vm173_vm2, %v3878_v4  ;;  %v4046_v17 = vld [vmem:[#allocation2] sm:$0xff]  ;;  %v4048_v18 = vld [vmem:[#allocation2 + $0x8] sm:$0xff]  ;;  %v2983_v29 = vunpack.c.l.bf16 %v3032_v15  ;;  %v2984_v30 = vunpack.c.h.bf16 %v3032_v15  ;;  %v2987_v35 = vunpack.c.l.bf16 %v3033_v16  ;;  %v2988_v36 = vunpack.c.h.bf16 %v3033_v16  ;;  %p3821_p0 = scmp.lt.s32.totalorder %s4925_s10, %s3819_s25  ;;  %p3822_p1 = scmp.lt.s32.totalorder %s3820_s26, %s3814_s20 }
  0x20   : > { %188 = vst.msk [vmem:[#allocation2 + $0x80] sm:$0xff] %vm170_vm1, %v3878_v4  ;;  %190 = vst.msk [vmem:[#allocation2 + $0x90] sm:$0xff] %vm170_vm1, %v3878_v4  ;;  %v4050_v19 = vld [vmem:[#allocation2 + $0x10] sm:$0x3]  ;;  %v443_v24 = vrot.slane %v4046_v17, 1  ;;  %v444_v25 = vrot.slane %v4048_v18, 1  ;;  %p3816_p12 = pnand %p3815_p11, %p3940_p5 }
  0x21   : > { %191 = vst.msk [vmem:[#allocation2 + $0x98] sm:$0xff] %vm170_vm1, %v3878_v4  ;;  %193 = vst.msk [vmem:[#allocation2 + $0xa8] sm:$0xff] %vm170_vm1, %v3878_v4  ;;  %v446_v26 = vrot.slane %v4050_v19, 1  ;;  %v3034_v27 = vld [vmem:[%s4038_s9 + $0x30] sm:$0xff]   ;;  %v3035_v28 = vld [vmem:[%s4038_s9 + $0x38] sm:$0xff]   ;;  %p3823_p2 = por %p3822_p1, %p3821_p0 }
  0x22   : > { %192 = vst.msk [vmem:[#allocation2 + $0xa0] sm:$0x3] %vm173_vm2, %v3878_v4  ;;  %195 = vst.msk [vmem:[#allocation2 + $0xb8] sm:$0x3] %vm173_vm2, %v3878_v4  ;;  %v3036_v31 = vld [vmem:[%s4038_s9 + $0x40] sm:$0xff]   ;;  %v3037_v32 = vld [vmem:[%s4038_s9 + $0x48] sm:$0xff]   ;;  %v445_v33 = vsel %vm442_vm3, %v443_v24, %v444_v25  ;;  %v2991_v40 = vunpack.c.l.bf16 %v3034_v27  ;;  %v2992_v41 = vunpack.c.h.bf16 %v3034_v27  ;;  %v2995_v42 = vunpack.c.l.bf16 %v3035_v28  ;;  %p3817_p13 = pneg %p3816_p12 }
  0x23   : > { %194 = vst.msk [vmem:[#allocation2 + $0xb0] sm:$0xff] %vm170_vm1, %v3878_v4  ;;  %196 = vst.msk [vmem:[#allocation2 + $0xc0] sm:$0xff] %vm170_vm1, %v3878_v4  ;;  %v447_v34 = vsel %vm442_vm3, %v444_v25, %v446_v26  ;;  %v3038_v37 = vld [vmem:[%s4038_s9 + $0x50] sm:$0xff]   ;;  %v3039_v38 = vld [vmem:[%s4038_s9 + $0x58] sm:$0xff]   ;;  %v2996_v45 = vunpack.c.h.bf16 %v3035_v28  ;;  %v2999_v46 = vunpack.c.l.bf16 %v3036_v31  ;;  %v3000_v47 = vunpack.c.h.bf16 %v3036_v31 }
  0x24   : > { %197 = vst.msk [vmem:[#allocation2 + $0xc8] sm:$0xff] %vm170_vm1, %v3878_v4  ;;  %199 = vst.msk [vmem:[#allocation2 + $0xd8] sm:$0xff] %vm170_vm1, %v3878_v4  ;;  %v555_v39 = vpack.c.bf16 %v447_v34, %v445_v33  ;;  %v3040_v43 = vld [vmem:[%s4038_s9 + $0x60] sm:$0xff]   ;;  %v3041_v44 = vld [vmem:[%s4038_s9 + $0x68] sm:$0xff]   ;;  %v3003_v48 = vunpack.c.l.bf16 %v3037_v32  ;;  %v3004_v50 = vunpack.c.h.bf16 %v3037_v32  ;;  %v3007_v51 = vunpack.c.l.bf16 %v3038_v37  ;;  %p3824_p3 = pnand %p3823_p2, %p3817_p13 }
  0x25   : > { %198 = vst.msk [vmem:[#allocation2 + $0xd0] sm:$0x3] %vm173_vm2, %v3878_v4  ;;  %201 = vst.msk [vmem:[#allocation2 + $0xe8] sm:$0x3] %vm173_vm2, %v3878_v4  ;;  %v3042_v49 = vld [vmem:[%s4038_s9 + $0x70] sm:$0xff]   ;;  %v3008_v52 = vunpack.c.h.bf16 %v3038_v37  ;;  %v3011_v53 = vunpack.c.l.bf16 %v3039_v38  ;;  %v3012_v54 = vunpack.c.h.bf16 %v3039_v38  ;;  %v3015_v55 = vunpack.c.l.bf16 %v3040_v43 }
  0x26   : > { %200 = vst.msk [vmem:[#allocation2 + $0xe0] sm:$0xff] %vm170_vm1, %v3878_v4  ;;  %202 = vst.msk [vmem:[#allocation2 + $0xf0] sm:$0xff] %vm170_vm1, %v3878_v4  ;;  %3199 = vmatprep.mubr.msk.bf16.mxu1 %vm170_vm1, %v555_v39  ;;  %v3016_v56 = vunpack.c.h.bf16 %v3040_v43  ;;  %v3019_v57 = vunpack.c.l.bf16 %v3041_v44  ;;  %v3020_v61 = vunpack.c.h.bf16 %v3041_v44  ;;  %v3023_v62 = vunpack.c.l.bf16 %v3042_v49  ;;  %v4170_v44 = vld [vmem:[%s4974_s1 + $0xc] sm:$0x3] }
  0x27   : > { %203 = vst.msk [vmem:[#allocation2 + $0xf8] sm:$0xff] %vm170_vm1, %v3878_v4  ;;  %205 = vst.msk [vmem:[#allocation2 + $0x108] sm:$0xff] %vm170_vm1, %v3878_v4  ;;  %v3024_v63 = vunpack.c.h.bf16 %v3042_v49 }
  0x28   : > { %204 = vst.msk [vmem:[#allocation2 + $0x100] sm:$0x3] %vm173_vm2, %v3878_v4  ;;  %207 = vst.msk [vmem:[#allocation2 + $0x118] sm:$0x3] %vm173_vm2, %v3878_v4 }
  0x29   : > { %206 = vst.msk [vmem:[#allocation2 + $0x110] sm:$0xff] %vm170_vm1, %v3878_v4  ;;  %208 = vst.msk [vmem:[#allocation2 + $0x120] sm:$0xff] %vm170_vm1, %v3878_v4 }
  0x2a   : > { %209 = vst.msk [vmem:[#allocation2 + $0x128] sm:$0xff] %vm170_vm1, %v3878_v4  ;;  %211 = vst.msk [vmem:[#allocation2 + $0x138] sm:$0xff] %vm170_vm1, %v3878_v4 }
  0x2b   : > { %210 = vst.msk [vmem:[#allocation2 + $0x130] sm:$0x3] %vm173_vm2, %v3878_v4  ;;  %213 = vst.msk [vmem:[#allocation2 + $0x148] sm:$0x3] %vm173_vm2, %v3878_v4 }
  0x2c   : > { %212 = vst.msk [vmem:[#allocation2 + $0x140] sm:$0xff] %vm170_vm1, %v3878_v4  ;;  %214 = vst.msk [vmem:[#allocation2 + $0x150] sm:$0xff] %vm170_vm1, %v3878_v4 }
  0x2d   : > { %215 = vst.msk [vmem:[#allocation2 + $0x158] sm:$0xff] %vm170_vm1, %v3878_v4  ;;  %217 = vst.msk [vmem:[#allocation2 + $0x168] sm:$0xff] %vm170_vm1, %v3878_v4 }
  0x2e   : > { %216 = vst.msk [vmem:[#allocation2 + $0x160] sm:$0x3] %vm173_vm2, %v3878_v4  ;;  %219 = vst.msk [vmem:[#allocation2 + $0x178] sm:$0x3] %vm173_vm2, %v3878_v4 }
  0x2f   : > { %218 = vst.msk [vmem:[#allocation2 + $0x170] sm:$0xff] %vm170_vm1, %v3878_v4  ;;  %220 = vst.msk [vmem:[#allocation2 + $0x180] sm:$0xff] %vm170_vm1, %v3878_v4 }
  0x30   : > { %221 = vst.msk [vmem:[#allocation2 + $0x188] sm:$0xff] %vm170_vm1, %v3878_v4  ;;  %223 = vst.msk [vmem:[#allocation2 + $0x198] sm:$0xff] %vm170_vm1, %v3878_v4 }
  0x31   : > { %222 = vst.msk [vmem:[#allocation2 + $0x190] sm:$0x3] %vm173_vm2, %v3878_v4  ;;  %225 = vst.msk [vmem:[#allocation2 + $0x1a8] sm:$0x3] %vm173_vm2, %v3878_v4 }
  0x32   : > { %224 = vst.msk [vmem:[#allocation2 + $0x1a0] sm:$0xff] %vm170_vm1, %v3878_v4  ;;  %291 = vst.msk [vmem:[#allocation2 + $0x19] sm:$0xff] %vm170_vm1, %v2967_v10 }
  0x33   : > { %292 = vst.msk [vmem:[#allocation2 + $0x21] sm:$0xff] %vm170_vm1, %v2968_v11  ;;  %293 = vst.msk [vmem:[#allocation2 + $0x31] sm:$0xff] %vm170_vm1, %v2971_v12  ;;  %v835_v11 = vsel %vm621_vm0, %v4021_v5, 0  ;;  %v1801_v5 = vsel %vm621_vm0, %v4026_v6, 0 }
  0x34   : > { %294 = vst.msk [vmem:[#allocation2 + $0x39] sm:$0xff] %vm170_vm1, %v2972_v13  ;;  %295 = vst.msk [vmem:[#allocation2 + $0x49] sm:$0xff] %vm170_vm1, %v2975_v20 }
  0x35   : > { %296 = vst.msk [vmem:[#allocation2 + $0x51] sm:$0xff] %vm170_vm1, %v2976_v21  ;;  %297 = vst.msk [vmem:[#allocation2 + $0x61] sm:$0xff] %vm170_vm1, %v2979_v22 }
  0x36   : > { %298 = vst.msk [vmem:[#allocation2 + $0x69] sm:$0xff] %vm170_vm1, %v2980_v23  ;;  %299 = vst.msk [vmem:[#allocation2 + $0x79] sm:$0xff] %vm170_vm1, %v2983_v29 }
  0x37   : > { %300 = vst.msk [vmem:[#allocation2 + $0x81] sm:$0xff] %vm170_vm1, %v2984_v30  ;;  %301 = vst.msk [vmem:[#allocation2 + $0x91] sm:$0xff] %vm170_vm1, %v2987_v35 }
  0x38   : > { %302 = vst.msk [vmem:[#allocation2 + $0x99] sm:$0xff] %vm170_vm1, %v2988_v36  ;;  %303 = vst.msk [vmem:[#allocation2 + $0xa9] sm:$0xff] %vm170_vm1, %v2991_v40  ;;  %v4162_v40 = vld [vmem:[%s4974_s1 + $0x4] sm:$0x3] }
  0x39   : > { %304 = vst.msk [vmem:[#allocation2 + $0xb1] sm:$0xff] %vm170_vm1, %v2992_v41  ;;  %305 = vst.msk [vmem:[#allocation2 + $0xc1] sm:$0xff] %vm170_vm1, %v2995_v42  ;;  %v4086_v58 = vld [vmem:[#allocation2 + $0x18] sm:$0xff] }
  0x3a   : > { %306 = vst.msk [vmem:[#allocation2 + $0xc9] sm:$0xff] %vm170_vm1, %v2996_v45  ;;  %307 = vst.msk [vmem:[#allocation2 + $0xd9] sm:$0xff] %vm170_vm1, %v2999_v46  ;;  %v4088_v59 = vld [vmem:[#allocation2 + $0x20] sm:$0xff]  ;;  %v4090_v60 = vld [vmem:[#allocation2 + $0x28] sm:$0x3]  ;;  %v448_v1 = vrot.slane %v4086_v58, 1 }
  0x3b   : > { %308 = vst.msk [vmem:[#allocation2 + $0xe1] sm:$0xff] %vm170_vm1, %v3000_v47  ;;  %309 = vst.msk [vmem:[#allocation2 + $0xf1] sm:$0xff] %vm170_vm1, %v3003_v48  ;;  %v449_v2 = vrot.slane %v4088_v59, 1  ;;  %v451_v4 = vrot.slane %v4090_v60, 1  ;;  %v4101_v7 = vld [vmem:[#allocation2 + $0x30] sm:$0xff]  ;;  %v4103_v8 = vld [vmem:[#allocation2 + $0x38] sm:$0xff]  ;;  %v4113_v10 = vpack.c.bf16 %v4088_v59, %v4086_v58 }
  0x3c   : > { %310 = vst.msk [vmem:[#allocation2 + $0xf9] sm:$0xff] %vm170_vm1, %v3004_v50  ;;  %311 = vst.msk [vmem:[#allocation2 + $0x109] sm:$0xff] %vm170_vm1, %v3007_v51  ;;  %v4105_v9 = vld [vmem:[#allocation2 + $0x48] sm:$0xff]  ;;  %v4117_v12 = vld [vmem:[#allocation2 + $0x40] sm:$0x3]  ;;  %v453_v13 = vrot.slane %v4101_v7, 1 }
  0x3d   : > { %312 = vst.msk [vmem:[#allocation2 + $0x111] sm:$0xff] %vm170_vm1, %v3008_v52  ;;  %313 = vst.msk [vmem:[#allocation2 + $0x121] sm:$0xff] %vm170_vm1, %v3011_v53  ;;  %v454_v14 = vrot.slane %v4103_v8, 1  ;;  %v450_v15 = vsel %vm442_vm3, %v448_v1, %v449_v2  ;;  %v452_v16 = vsel %vm442_vm3, %v449_v2, %v451_v4  ;;  %v456_v20 = vrot.slane %v4117_v12, 1  ;;  %v4129_v21 = vld [vmem:[#allocation2 + $0x50] sm:$0xff]  ;;  %v4133_v23 = vld [vmem:[#allocation2 + $0x60] sm:$0xff] }
  0x3e   : > { %314 = vst.msk [vmem:[#allocation2 + $0x129] sm:$0xff] %vm170_vm1, %v3012_v54  ;;  %315 = vst.msk [vmem:[#allocation2 + $0x139] sm:$0xff] %vm170_vm1, %v3015_v55  ;;  %v4131_v22 = vld [vmem:[#allocation2 + $0x58] sm:$0x3]  ;;  %v556_v24 = vpack.c.bf16 %v452_v16, %v450_v15  ;;  %v458_v26 = vrot.slane %v4105_v9, 1  ;;  %v459_v27 = vrot.slane %v4129_v21, 1 }
  0x3f   : > { %316 = vst.msk [vmem:[#allocation2 + $0x141] sm:$0xff] %vm170_vm1, %v3016_v56  ;;  %317 = vst.msk [vmem:[#allocation2 + $0x151] sm:$0xff] %vm170_vm1, %v3019_v57  ;;  %v455_v25 = vsel %vm442_vm3, %v453_v13, %v454_v14  ;;  %v4138_v28 = vld [vmem:[#allocation2 + $0x68] sm:$0xff]  ;;  %v4140_v29 = vld [vmem:[#allocation2 + $0x70] sm:$0x3]  ;;  %v457_v6 = vsel %vm442_vm3, %v454_v14, %v456_v20  ;;  %v461_v31 = vrot.slane %v4131_v22, 1 }
  0x40   : > { %318 = vst.msk [vmem:[#allocation2 + $0x159] sm:$0xff] %vm170_vm1, %v3020_v61  ;;  %319 = vst.msk [vmem:[#allocation2 + $0x169] sm:$0xff] %vm170_vm1, %v3023_v62  ;;  %v4142_v30 = vld [vmem:[#allocation2 + $0x78] sm:$0xff]  ;;  %v463_v32 = vrot.slane %v4133_v23, 1  ;;  %v464_v33 = vrot.slane %v4138_v28, 1  ;;  %v4148_v34 = vld [vmem:[#allocation2 + $0x80] sm:$0xff]  ;;  %3200 = vmatmul.mubr.msk.bf16.vlgmr.msra.gmra.mrb[0].mxu1 %vm170_vm1, %v556_v24  ;;  %3335 = vmatprep.mubr.msk.bf16.mxu0 %vm170_vm1, %v556_v24  ;;  %v4154_v36 = vpack.c.bf16 %v457_v6, %v455_v25 }
  0x41   : > { %320 = vst.msk [vmem:[#allocation2 + $0x171] sm:$0xff] %vm170_vm1, %v3024_v63  ;;  %v4150_v35 = vld [vmem:[#allocation2 + $0x88] sm:$0x3]  ;;  %v460_v37 = vsel %vm442_vm3, %v458_v26, %v459_v27  ;;  %v466_v38 = vrot.slane %v4140_v29, 1  ;;  %v468_v39 = vrot.slane %v4142_v30, 1  ;;  %3232 = vmatpush3.bf16.msra.mxu1 %v835_v11  ;;  %v462_v41 = vsel %vm442_vm3, %v459_v27, %v461_v31  ;;  %v4186_v50 = vld [vmem:[#allocation2 + $0x90] sm:$0xff] }
  0x42   : > { %5004 = vst [vmem:[#allocation7_spill] sm:$0xff] %v4154_v36  ;;  %v469_v42 = vrot.slane %v4148_v34, 1  ;;  %v471_v43 = vrot.slane %v4150_v35, 1  ;;  %3336 = vmatmul.mubr.msk.bf16.vlgmr.msra.gmra.mrb[0].mxu0 %vm170_vm1, %v4154_v36  ;;  %3203 = vmatprep.mubr.msk.bf16.mxu1 %vm170_vm1, %v4154_v36  ;;  %v4176_v45 = vpack.c.bf16 %v462_v41, %v460_v37  ;;  %v465_v46 = vsel %vm442_vm3, %v463_v32, %v464_v33  ;;  %v4188_v51 = vld [vmem:[#allocation2 + $0x98] sm:$0xff]  ;;  %v4190_v52 = vld [vmem:[#allocation2 + $0xa0] sm:$0x3] }
  0x43   : > { %3368 = vmatpush3.bf16.msra.mxu0 %v1801_v5  ;;  %v467_v47 = vsel %vm442_vm3, %v464_v33, %v466_v38  ;;  %3763 = vmatprep.subr.msk.bf16.mxu1 %vm621_vm0, %v4162_v40  ;;  %v4194_v53 = vld [vmem:[#allocation2 + $0xa8] sm:$0xff]  ;;  %v4196_v54 = vld [vmem:[#allocation2 + $0xb0] sm:$0xff]  ;;  %v4198_v55 = vld [vmem:[#allocation2 + $0xb8] sm:$0x3]  ;;  %v473_v61 = vrot.slane %v4186_v50, 1  ;;  %v474_v62 = vrot.slane %v4188_v51, 1 }
  0x44   : > { %5005 = vst [vmem:[#allocation8_spill] sm:$0xff] %v4176_v45  ;;  %3339 = vmatprep.mubr.msk.bf16.mxu0 %vm170_vm1, %v4176_v45  ;;  %v470_v48 = vsel %vm442_vm3, %v468_v39, %v469_v42  ;;  %v472_v49 = vsel %vm442_vm3, %v469_v42, %v471_v43  ;;  %3768 = vmatprep.subr.msk.bf16.mxu0 %vm621_vm0, %v4170_v44  ;;  %v476_v63 = vrot.slane %v4190_v52, 1  ;;  %v478_v1 = vrot.slane %v4194_v53, 1  ;;  %v4222_v16 = vld [vmem:[#allocation2 + $0xc0] sm:$0xff]  ;;  %v4224_v20 = vld [vmem:[#allocation2 + $0xc8] sm:$0xff]  ;;  %v4230_v25 = vld [vmem:[#allocation2 + $0xd8] sm:$0xff] }
  0x45   : > { %v4200_v56 = vpack.c.bf16 %v467_v47, %v465_v46  ;;  %v4202_v57 = vpack.c.bf16 %v472_v49, %v470_v48  ;;  %v479_v2 = vrot.slane %v4196_v54, 1  ;;  %v481_v4 = vrot.slane %v4198_v55, 1  ;;  %v4226_v5 = vld [vmem:[#allocation2 + $0xd0] sm:$0x3]  ;;  %v4237_v32 = vld [vmem:[#allocation2 + $0xe0] sm:$0xff] }
  0x46   : > { %v475_v11 = vsel %vm442_vm3, %v473_v61, %v474_v62  ;;  %v477_v13 = vsel %vm442_vm3, %v474_v62, %v476_v63  ;;  %v483_v27 = vrot.slane %v4222_v16, 1  ;;  %v484_v6 = vrot.slane %v4224_v20, 1  ;;  %v4239_v33 = vld [vmem:[#allocation2 + $0xe8] sm:$0x3]  ;;  %v4248_v41 = vld [vmem:[#allocation2 + $0xf0] sm:$0xff] }
  0x47   : > { %5006 = vst [vmem:[#allocation9_spill] sm:$0xff] %v4200_v56  ;;  %5007 = vst [vmem:[#allocation10_spill] sm:$0xff] %v4202_v57  ;;  %v480_v14 = vsel %vm442_vm3, %v478_v1, %v479_v2  ;;  %v482_v15 = vsel %vm442_vm3, %v479_v2, %v481_v4  ;;  %v4228_v24 = vpack.c.bf16 %v477_v13, %v475_v11  ;;  %v486_v31 = vrot.slane %v4226_v5, 1  ;;  %v4268_v1 = vld [vmem:[#allocation2 + $0x108] sm:$0xff]  ;;  %v4270_v2 = vld [vmem:[#allocation2 + $0x110] sm:$0xff] }
  0x48   : > { %3204 = vmatmul.mubr.msk.bf16.gmra.mrb[4].mxu1 %vm170_vm1, %v4176_v45  ;;  %v4232_v26 = vpack.c.bf16 %v482_v15, %v480_v14  ;;  %v1004_v37 = vrot.slane %v4086_v58, 2  ;;  %v1005_v38 = vrot.slane %v4088_v59, 2  ;;  %v1007_v39 = vrot.slane %v4090_v60, 2  ;;  %v4255_v58 = vld [vmem:[#allocation2 + $0xf8] sm:$0xff]  ;;  %v4257_v59 = vld [vmem:[#allocation2 + $0x100] sm:$0x3] }
  0x49   : > { %3207 = vmatprep.mubr.msk.bf16.mxu1 %vm170_vm1, %v4200_v56  ;;  %5008 = vst [vmem:[#allocation11_spill] sm:$0xff] %v4228_v24  ;;  %v488_v42 = vrot.slane %v4230_v25, 1  ;;  %v489_v43 = vrot.slane %v4237_v32, 1  ;;  %v491_v46 = vrot.slane %v4239_v33, 1  ;;  %v1009_v60 = vrot.slane %v4101_v7, 2 }
  0x4a   : > { %3340 = vmatmul.mubr.msk.bf16.gmra.mrb[4].mxu0 %vm170_vm1, %v4200_v56  ;;  %5009 = vst [vmem:[#allocation12_spill] sm:$0xff] %v4232_v26  ;;  %v1010_v47 = vrot.slane %v4103_v8, 2  ;;  %v485_v48 = vsel %vm442_vm3, %v483_v27, %v484_v6  ;;  %v487_v49 = vsel %vm442_vm3, %v484_v6, %v486_v31  ;;  %v1012_v61 = vrot.slane %v4117_v12, 2  ;;  %v4279_v27 = vld [vmem:[#allocation2 + $0x118] sm:$0x3] }
  0x4b   : > { %3343 = vmatprep.mubr.msk.bf16.mxu0 %vm170_vm1, %v4202_v57  ;;  %v1006_v62 = vsel %vm998_vm4, %v1004_v37, %v1005_v38  ;;  %v1008_v63 = vsel %vm998_vm4, %v1005_v38, %v1007_v39  ;;  %v493_v4 = vrot.slane %v4248_v41, 1  ;;  %v494_v11 = vrot.slane %v4255_v58, 1 }
  0x4c   : > { %v496_v13 = vrot.slane %v4257_v59, 1  ;;  %v4275_v14 = vpack.c.bf16 %v487_v49, %v485_v48  ;;  %v490_v15 = vsel %vm442_vm3, %v488_v42, %v489_v43  ;;  %v492_v12 = vsel %vm442_vm3, %v489_v43, %v491_v46 }
  0x4d   : > { %v4281_v6 = vpack.c.bf16 %v1008_v63, %v1006_v62  ;;  %v1011_v31 = vsel %vm998_vm4, %v1009_v60, %v1010_v47  ;;  %v498_v37 = vrot.slane %v4268_v1, 1  ;;  %v499_v38 = vrot.slane %v4270_v2, 1  ;;  %v4299_v62 = vld [vmem:[#allocation2 + $0x120] sm:$0xff] }
  0x4e   : > { %5010 = vst [vmem:[#allocation13_spill] sm:$0xff] %v4275_v14  ;;  %v1013_v39 = vsel %vm998_vm4, %v1010_v47, %v1012_v61  ;;  %v1014_v48 = vrot.slane %v4105_v9, 2  ;;  %v1015_v42 = vrot.slane %v4129_v21, 2  ;;  %v1017_v43 = vrot.slane %v4131_v22, 2  ;;  %v4301_v47 = vld [vmem:[#allocation2 + $0x128] sm:$0xff] }
  0x4f   : > { %v495_v46 = vsel %vm442_vm3, %v493_v4, %v494_v11  ;;  %v497_v60 = vsel %vm442_vm3, %v494_v11, %v496_v13  ;;  %v501_v49 = vrot.slane %v4279_v27, 1  ;;  %v4303_v61 = vpack.c.bf16 %v492_v12, %v490_v15  ;;  %v4310_v4 = vld [vmem:[#allocation2 + $0x130] sm:$0x3]  ;;  %v4312_v11 = vld [vmem:[#allocation2 + $0x138] sm:$0xff]  ;;  %v4314_v13 = vld [vmem:[#allocation2 + $0x140] sm:$0xff] }
  0x50   : > { %3208 = vmatmul.mubr.msk.bf16.gmra.mrb[8].mxu1 %vm170_vm1, %v4202_v57  ;;  %v4307_v22 = vpack.c.bf16 %v1013_v39, %v1011_v31  ;;  %v500_v63 = vsel %vm442_vm3, %v498_v37, %v499_v38  ;;  %v4316_v0 = vpack.c.bf16 %v497_v60, %v495_v46  ;;  %v1016_v3 = vsel %vm998_vm4, %v1014_v48, %v1015_v42 }
  0x51   : > { %3211 = vmatprep.mubr.msk.bf16.mxu1 %vm170_vm1, %v4228_v24  ;;  %5011 = vst [vmem:[#allocation14_spill] sm:$0xff] %v4303_v61  ;;  %v1018_v15 = vsel %vm998_vm4, %v1015_v42, %v1017_v43  ;;  %v1019_v12 = vrot.slane %v4133_v23, 2  ;;  %v502_v31 = vsel %vm442_vm3, %v499_v38, %v501_v49  ;;  %v1020_v37 = vrot.slane %v4138_v28, 2 }
  0x52   : > { %3344 = vmatmul.mubr.msk.bf16.gmra.mrb[8].mxu0 %vm170_vm1, %v4228_v24  ;;  %5012 = vst [vmem:[#allocation15_spill] sm:$0xff] %v4307_v22  ;;  %5013 = vst [vmem:[#allocation16_spill] sm:$0xff] %v4316_v0  ;;  %v1022_v39 = vrot.slane %v4140_v29, 2  ;;  %v504_v24 = vrot.slane %v4301_v47, 1  ;;  %v506_v46 = vrot.slane %v4310_v4, 1  ;;  %v508_v48 = vrot.slane %v4312_v11, 1 }
  0x53   : > { %3347 = vmatprep.mubr.msk.bf16.mxu0 %vm170_vm1, %v4232_v26  ;;  %v509_v42 = vrot.slane %v4314_v13, 1  ;;  %v4331_v43 = vpack.c.bf16 %v1018_v15, %v1016_v3  ;;  %v4336_v38 = vpack.c.bf16 %v4103_v8, %v4101_v7  ;;  %v4340_v29 = vpack.c.bf16 %v4129_v21, %v4105_v9  ;;  %v4359_v21 = vld [vmem:[%s4974_s1 + $0xe] sm:$0x3] }
  0x54   : > { %v2003_v49 = vsel %vm621_vm0, %v4170_v44, 0  ;;  %v1024_v57 = vrot.slane %v4142_v30, 2  ;;  %v1025_v3 = vrot.slane %v4148_v34, 2  ;;  %v1027_v15 = vrot.slane %v4150_v35, 2 }
  0x55   : > { %5014 = vst [vmem:[#allocation17_spill] sm:$0xff] %v4331_v43  ;;  %v4353_v8 = vpack.c.bf16 %v502_v31, %v500_v63  ;;  %v1021_v9 = vsel %vm998_vm4, %v1019_v12, %v1020_v37  ;;  %v1023_v35 = vsel %vm998_vm4, %v1020_v37, %v1022_v39  ;;  %v507_v56 = vsel %vm442_vm3, %v504_v24, %v506_v46  ;;  %v4367_v63 = vld [vmem:[#allocation2 + $0x150] sm:$0xff]  ;;  %v4369_v31 = vld [vmem:[#allocation2 + $0x158] sm:$0xff]  ;;  %v4375_v37 = vld [vmem:[#allocation2 + $0x160] sm:$0x3] }
  0x56   : > { %v510_v7 = vsel %vm442_vm3, %v508_v48, %v509_v42  ;;  %v1002_v12 = vrot.slane %v4050_v19, 2  ;;  %v1026_v39 = vsel %vm998_vm4, %v1024_v57, %v1025_v3  ;;  %v1028_v19 = vsel %vm998_vm4, %v1025_v3, %v1027_v15  ;;  %v3043_v57 = vld [vmem:[%s4038_s9 + $0x78] sm:$0xff]   ;;  %s2964_s9 = sshll.u32 %s3923_s16, 12  ;;  %s4932_s16 = scalar_lea.sflag [#allocation4], %s161_s4 }
  0x57   : > { %5015 = vst [vmem:[#allocation18_spill] sm:$0xff] %v4353_v8  ;;  %v1029_v46 = vrot.slane %v4186_v50, 2  ;;  %v1030_v48 = vrot.slane %v4188_v51, 2  ;;  %v4404_v3 = vpack.c.bf16 %v4188_v51, %v4186_v50  ;;  %v4412_v15 = vpack.c.bf16 %v1028_v19, %v1026_v39  ;;  %v4432_v19 = vld [vmem:[#allocation2 + $0x170] sm:$0xff]  ;;  %s4923_s19 = scalar_lea.hbm %s4976_s3, %s2964_s9 }
  0x58   : > { %3212 = vmatmul.mubr.msk.bf16.gmra.mrb[12].mxu1 %vm170_vm1, %v4232_v26  ;;  %v503_v26 = vrot.slane %v4299_v62, 1  ;;  %v1037_v51 = vrot.slane %v4198_v55, 2  ;;  %v4434_v55 = vld [vmem:[#allocation2 + $0x178] sm:$0x3] }
  0x59   : > { %3215 = vmatprep.mubr.msk.bf16.mxu1 %vm170_vm1, %v4275_v14  ;;  %5018 = vst [vmem:[#allocation21_spill] sm:$0xff] %v4412_v15 }
  0x5a   : > { %3348 = vmatmul.mubr.msk.bf16.gmra.mrb[12].mxu0 %vm170_vm1, %v4275_v14  ;;  %v4321_v14 = vld [vmem:[#allocation2 + $0x148] sm:$0x3]  ;;  %v505_v44 = vsel %vm442_vm3, %v503_v26, %v504_v24  ;;  %v4379_v24 = vpack.c.bf16 %v4138_v28, %v4133_v23  ;;  %v4383_v26 = vpack.c.bf16 %v4148_v34, %v4142_v30  ;;  %v1032_v23 = vrot.slane %v4190_v52, 2 }
  0x5b   : > { %3369 = vmatprep.mubr.msk.bf16.mxu0 %vm170_vm1, %v4281_v6  ;;  %v511_v60 = vrot.slane %v4321_v14, 1  ;;  %v513_v28 = vrot.slane %v4367_v63, 1  ;;  %v514_v30 = vrot.slane %v4369_v31, 1  ;;  %v4396_v34 = vld [vmem:[#allocation2 + $0x168] sm:$0xff] }
  0x5c   : > { %v518_v50 = vrot.slane %v4396_v34, 1 }
  0x60   : > { %3216 = vmatmul.mubr.msk.bf16.gmra.mrb[16].mxu1 %vm170_vm1, %v4303_v61  ;;  %v1035_v61 = vrot.slane %v4196_v54, 2 }
  0x61   : > { %3219 = vmatprep.mubr.msk.bf16.mxu1 %vm170_vm1, %v4316_v0  ;;  %v512_v0 = vsel %vm442_vm3, %v509_v42, %v511_v60  ;;  %v4391_v42 = vpack.c.bf16 %v507_v56, %v505_v44  ;;  %v4399_v60 = vpack.c.bf16 %v1023_v35, %v1021_v9  ;;  %v4408_v56 = vpack.c.bf16 %v4196_v54, %v4194_v53 }
  0x62   : > { %3370 = vmatmul.mubr.msk.bf16.vlgmr.msra.gmra.mrb[0].mxu0 %vm170_vm1, %v4307_v22  ;;  %v4410_v52 = vpack.c.bf16 %v512_v0, %v510_v7  ;;  %v1034_v44 = vrot.slane %v4194_v53, 2  ;;  %v1031_v9 = vsel %vm998_vm4, %v1029_v46, %v1030_v48  ;;  %v3027_v35 = vunpack.c.l.bf16 %v3043_v57 }
  0x63   : > { %3402 = vmatpush3.bf16.msra.mxu0 %v2003_v49  ;;  %3373 = vmatprep.mubr.msk.bf16.mxu0 %vm170_vm1, %v4331_v43  ;;  %5016 = vst [vmem:[#allocation19_spill] sm:$0xff] %v4391_v42  ;;  %5017 = vst [vmem:[#allocation20_spill] sm:$0xff] %v4399_v60  ;;  %v516_v49 = vrot.slane %v4375_v37, 1  ;;  %v1033_v0 = vsel %vm998_vm4, %v1030_v48, %v1032_v23  ;;  %v515_v7 = vsel %vm442_vm3, %v513_v28, %v514_v30 }
  0x64   : > { %3769 = vmatprep.subr.msk.bf16.mxu0 %vm621_vm0, %v4359_v21  ;;  %v3028_v53 = vunpack.c.h.bf16 %v3043_v57  ;;  %v4427_v54 = vpack.c.bf16 %v4224_v20, %v4222_v16  ;;  %321 = vst.msk [vmem:[#allocation2 + $0x181] sm:$0xff] %vm170_vm1, %v3027_v35  ;;  %v4439_v46 = vpack.c.bf16 %v4237_v32, %v4230_v25  ;;  %v4443_v48 = vpack.c.bf16 %v4255_v58, %v4248_v41 }
  0x65   : > { %v517_v39 = vsel %vm442_vm3, %v514_v30, %v516_v49  ;;  %v4447_v23 = vpack.c.bf16 %v4270_v2, %v4268_v1  ;;  %v1036_v28 = vsel %vm998_vm4, %v1034_v44, %v1035_v61  ;;  %v4455_v30 = vpack.c.bf16 %v4301_v47, %v4299_v62 }
  0x66   : > { %322 = vst.msk [vmem:[#allocation2 + $0x189] sm:$0xff] %vm170_vm1, %v3028_v53  ;;  %v4459_v57 = vpack.c.bf16 %v4314_v13, %v4312_v11  ;;  %v4463_v49 = vpack.c.bf16 %v4369_v31, %v4367_v63  ;;  %v1038_v35 = vsel %vm998_vm4, %v1035_v61, %v1037_v51  ;;  %v5019_v44 = vrot.slane %v4048_v18, 2 }
  0x67   : > { %v5020_v53 = vrot.slane %v4046_v17, 2  ;;  %v519_v61 = vrot.slane %v4432_v19, 1  ;;  %v521_v51 = vrot.slane %v4434_v55, 1  ;;  %v4488_v43 = vpack.c.bf16 %v1033_v0, %v1031_v9 }
  0x68   : > { %3220 = vmatmul.mubr.msk.bf16.gmra.mrb[20].mxu1 %vm170_vm1, %v4353_v8  ;;  %v5021_v45 = vmov %v5019_v44  ;;  %v4490_v22 = vpack.c.bf16 %v1038_v35, %v1036_v28  ;;  %v1049_v28 = vrot.slane %v4248_v41, 2  ;;  %v1050_v35 = vrot.slane %v4255_v58, 2 }
  0x69   : > { %3223 = vmatprep.mubr.msk.bf16.mxu1 %vm170_vm1, %v4391_v42  ;;  %v4468_v42 = vpack.c.bf16 %v4432_v19, %v4396_v34  ;;  %v4475_v8 = vsel %vm998_vm4, %v5020_v53, %v5019_v44  ;;  %v4480_v36 = vsel %vm998_vm4, %v5021_v45, %v1002_v12  ;;  %v1039_v44 = vrot.slane %v4222_v16, 2 }
  0x6a   : > { %3374 = vmatmul.mubr.msk.bf16.gmra.mrb[4].mxu0 %vm170_vm1, %v4399_v60  ;;  %v1111_v60 = vpack.c.bf16 %v4480_v36, %v4475_v8  ;;  %v1040_v53 = vrot.slane %v4224_v20, 2  ;;  %v1042_v45 = vrot.slane %v4226_v5, 2  ;;  %v1044_v12 = vrot.slane %v4230_v25, 2  ;;  %v3813_v36 = vld [vmem:[%s4974_s1 + $0x8] sm:$0x3] }
  0x6b   : > { %3377 = vmatprep.mubr.msk.bf16.mxu0 %vm170_vm1, %v4412_v15  ;;  %v4482_v15 = vpack.c.bf16 %v517_v39, %v515_v7  ;;  %v1045_v7 = vrot.slane %v4237_v32, 2  ;;  %v1047_v39 = vrot.slane %v4239_v33, 2  ;;  %v520_v9 = vsel %vm442_vm3, %v518_v50, %v519_v61  ;;  %v5024_v8 = vld [vmem:[#allocation17_spill] sm:$0xff] }
  0x6c   : > { %v522_v16 = vsel %vm442_vm3, %v519_v61, %v521_v51  ;;  %v1041_v20 = vsel %vm998_vm4, %v1039_v44, %v1040_v53  ;;  %v1043_v5 = vsel %vm998_vm4, %v1040_v53, %v1042_v45  ;;  %v1052_v61 = vrot.slane %v4257_v59, 2 }
  0x6d   : > { %v4510_v25 = vpack.c.bf16 %v522_v16, %v520_v9  ;;  %v1046_v32 = vsel %vm998_vm4, %v1044_v12, %v1045_v7  ;;  %v1048_v33 = vsel %vm998_vm4, %v1045_v7, %v1047_v39  ;;  %v4514_v0 = vpack.c.bf16 %v1043_v5, %v1041_v20  ;;  %v4550_v39 = vld [vmem:[%s4974_s1 + $0x6] sm:$0x3] }
  0x6e   : > { %v4516_v50 = vpack.c.bf16 %v1048_v33, %v1046_v32  ;;  %v1054_v51 = vrot.slane %v4268_v1, 2  ;;  %v1055_v44 = vrot.slane %v4270_v2, 2  ;;  %v1057_v53 = vrot.slane %v4279_v27, 2 }
  0x6f   : > { %v5022_v45 = vpack.c.bf16 %v4048_v18, %v4046_v17  ;;  %v1051_v41 = vsel %vm998_vm4, %v1049_v28, %v1050_v35  ;;  %v1053_v58 = vsel %vm998_vm4, %v1050_v35, %v1052_v61  ;;  %v1178_v2 = vsel %vm621_vm0, %v4162_v40, 0  ;;  %v372_v61 = vld [vmem:[#allocation2 + $0x188] sm:$0xff] }
  0x70   : > { %3224 = vmatmul.mubr.msk.bf16.gmra.mrb[24].mxu1 %vm170_vm1, %v4410_v52  ;;  %v1056_v59 = vsel %vm998_vm4, %v1054_v51, %v1055_v44  ;;  %v1058_v1 = vsel %vm998_vm4, %v1055_v44, %v1057_v53  ;;  %v4540_v17 = vpack.c.bf16 %v1053_v58, %v1051_v41  ;;  %v1059_v27 = vrot.slane %v4299_v62, 2 }
  0x71   : > { %3227 = vmatprep.mubr.msk.bf16.mxu1 %vm170_vm1, %v4482_v15  ;;  %v4542_v18 = vpack.c.bf16 %v1058_v1, %v1056_v59  ;;  %v1060_v12 = vrot.slane %v4301_v47, 2  ;;  %v1062_v7 = vrot.slane %v4310_v4, 2  ;;  %v1064_v40 = vrot.slane %v4312_v11, 2 }
  0x72   : > { %3378 = vmatmul.mubr.msk.bf16.gmra.mrb[8].mxu0 %vm170_vm1, %v4488_v43  ;;  %v1065_v9 = vrot.slane %v4314_v13, 2  ;;  %v1067_v16 = vrot.slane %v4321_v14, 2  ;;  %v1069_v20 = vrot.slane %v4367_v63, 2  ;;  %v1070_v5 = vrot.slane %v4369_v31, 2 }
  0x73   : > { %3381 = vmatprep.mubr.msk.bf16.mxu0 %vm170_vm1, %v4490_v22  ;;  %v1061_v62 = vsel %vm998_vm4, %v1059_v27, %v1060_v12  ;;  %v1063_v47 = vsel %vm998_vm4, %v1060_v12, %v1062_v7  ;;  %v1072_v32 = vrot.slane %v4375_v37, 2  ;;  %v1074_v33 = vrot.slane %v4396_v34, 2 }
  0x74   : > { %v1066_v4 = vsel %vm998_vm4, %v1064_v40, %v1065_v9  ;;  %v1068_v14 = vsel %vm998_vm4, %v1065_v9, %v1067_v16  ;;  %v4569_v11 = vpack.c.bf16 %v1063_v47, %v1061_v62  ;;  %v1075_v28 = vrot.slane %v4432_v19, 2  ;;  %v371_v19 = vld [vmem:[#allocation2 + $0x180] sm:$0xff]  ;;  %v2940_v62 = vld [vmem:[%s4974_s1 + $0x10] sm:$0x3]  ;;  %v5023_v47 = vld [vmem:[#allocation15_spill] sm:$0xff] }
  0x75   : > { %v4571_v13 = vpack.c.bf16 %v1068_v14, %v1066_v4  ;;  %v1077_v35 = vrot.slane %v4434_v55, 2  ;;  %v1071_v63 = vsel %vm998_vm4, %v1069_v20, %v1070_v5  ;;  %v1073_v31 = vsel %vm998_vm4, %v1070_v5, %v1072_v32  ;;  %v373_v55 = vld [vmem:[#allocation2 + $0x190] sm:$0x3]  ;;  %v374_v4 = vld [vmem:[#allocation2 + $0x198] sm:$0xff]  ;;  %v375_v14 = vld [vmem:[#allocation2 + $0x1a0] sm:$0xff] }
  0x76   : > { %v1076_v37 = vsel %vm998_vm4, %v1074_v33, %v1075_v28  ;;  %v4591_v51 = vpack.c.bf16 %v1073_v31, %v1071_v63  ;;  %v1787_v53 = vrot.slane %v371_v19, 2  ;;  %v1790_v41 = vrot.slane %v373_v55, 2  ;;  %v376_v32 = vld [vmem:[#allocation2 + $0x1a8] sm:$0x3] }
  0x77   : > { %v1078_v34 = vsel %vm998_vm4, %v1075_v28, %v1077_v35  ;;  %v1578_v1 = vrot.slane %v371_v19, 1  ;;  %v1581_v27 = vrot.slane %v373_v55, 1  ;;  %v2215_v16 = vsel %vm621_vm0, %v4359_v21, 0  ;;  %v5030_v55 = vld [vmem:[#allocation10_spill] sm:$0xff] }
  0x78   : > { %3228 = vmatmul.mubr.msk.bf16.gmra.mrb[28].mxu1 %vm170_vm1, %v4510_v25  ;;  %v4593_v44 = vpack.c.bf16 %v1078_v34, %v1076_v37  ;;  %v1380_v21 = vsel %vm621_vm0, %v4550_v39, 0  ;;  %v2410_v20 = vrot.slane %v374_v4, 2  ;;  %v2411_v5 = vrot.slane %v375_v14, 2  ;;  %v5027_v37 = vld [vmem:[#allocation7_spill] sm:$0xff] }
  0x79   : > { %3233 = vmatprep.mubr.msk.bf16.mxu1 %vm170_vm1, %v5022_v45  ;;  %v1788_v45 = vrot.slane %v372_v61, 2  ;;  %v2413_v33 = vrot.slane %v376_v32, 2  ;;  %v1996_v28 = vpack.c.bf16 %v375_v14, %v374_v4  ;;  %v2424_v34 = vsel %vm621_vm0, %v2940_v62, 0 }
  0x7a   : > { %3382 = vmatmul.mubr.msk.bf16.gmra.mrb[12].mxu0 %vm170_vm1, %v4514_v0  ;;  %v4692_v35 = vsel %vm998_vm4, %v2410_v20, %v2411_v5 }
  0x7b   : > { %3385 = vmatprep.mubr.msk.bf16.mxu0 %vm170_vm1, %v4516_v50  ;;  %v1789_v58 = vsel %vm998_vm4, %v1787_v53, %v1788_v45  ;;  %v1791_v59 = vsel %vm998_vm4, %v1788_v45, %v1790_v41  ;;  %v4695_v63 = vsel %vm998_vm4, %v2411_v5, %v2413_v33  ;;  %v5031_v53 = vld [vmem:[#allocation11_spill] sm:$0xff]  ;;  %v5032_v45 = vld [vmem:[#allocation12_spill] sm:$0xff]  ;;  %v5033_v41 = vld [vmem:[#allocation13_spill] sm:$0xff] }
  0x7c   : > { %v4605_v12 = vpack.c.bf16 %v1791_v59, %v1789_v58  ;;  %v2417_v31 = vpack.c.bf16 %v4695_v63, %v4692_v35  ;;  %v5034_v58 = vld [vmem:[#allocation14_spill] sm:$0xff]  ;;  %v5035_v59 = vld [vmem:[#allocation16_spill] sm:$0xff] }
  0x80   : > { %3234 = vmatmul.mubr.msk.bf16.vlgmr.msra.gmra.mrb[0].mxu1 %vm170_vm1, %v4113_v10 }
  0x81   : > { %3266 = vmatpush3.bf16.msra.mxu1 %v1178_v2  ;;  %3237 = vmatprep.mubr.msk.bf16.mxu1 %vm170_vm1, %v4336_v38  ;;  %v1579_v2 = vrot.slane %v372_v61, 1 }
  0x82   : > { %3386 = vmatmul.mubr.msk.bf16.gmra.mrb[16].mxu0 %vm170_vm1, %v4540_v17  ;;  %3764 = vmatprep.subr.msk.bf16.mxu1 %vm621_vm0, %v4550_v39  ;;  %v5026_v39 = vld [vmem:[#allocation21_spill] sm:$0xff] }
  0x83   : > { %3389 = vmatprep.mubr.msk.bf16.mxu0 %vm170_vm1, %v4542_v18  ;;  %v1580_v7 = vsel %vm442_vm3, %v1578_v1, %v1579_v2  ;;  %v1582_v40 = vsel %vm442_vm3, %v1579_v2, %v1581_v27  ;;  %v5036_v1 = vld [vmem:[#allocation6_spill] sm:$0xff]  ;;  %v5038_v27 = vld [vmem:[#allocation19_spill] sm:$0xff] }
  0x84   : > { %v4609_v9 = vpack.c.bf16 %v1582_v40, %v1580_v7  ;;  %v5037_v2 = vld [vmem:[#allocation18_spill] sm:$0xff] }
  0x88   : > { %3238 = vmatmul.mubr.msk.bf16.gmra.mrb[4].mxu1 %vm170_vm1, %v4340_v29 }
  0x89   : > { %3241 = vmatprep.mubr.msk.bf16.mxu1 %vm170_vm1, %v4379_v24 }
  0x8a   : > { %3390 = vmatmul.mubr.msk.bf16.gmra.mrb[20].mxu0 %vm170_vm1, %v4569_v11 }
  0x8b   : > { %3393 = vmatprep.mubr.msk.bf16.mxu0 %vm170_vm1, %v4571_v13 }
  0x90   : > { %3242 = vmatmul.mubr.msk.bf16.gmra.mrb[8].mxu1 %vm170_vm1, %v4383_v26 }
  0x91   : > { %3245 = vmatprep.mubr.msk.bf16.mxu1 %vm170_vm1, %v4404_v3 }
  0x92   : > { %3394 = vmatmul.mubr.msk.bf16.gmra.mrb[24].mxu0 %vm170_vm1, %v4591_v51 }
  0x93   : > { %3397 = vmatprep.mubr.msk.bf16.mxu0 %vm170_vm1, %v4593_v44 }
  0x98   : > { %3246 = vmatmul.mubr.msk.bf16.gmra.mrb[12].mxu1 %vm170_vm1, %v4408_v56 }
  0x99   : > { %3249 = vmatprep.mubr.msk.bf16.mxu1 %vm170_vm1, %v4427_v54 }
  0x9a   : > { %3398 = vmatmul.mubr.msk.bf16.gmra.mrb[28].mxu0 %vm170_vm1, %v4605_v12 }
  0x9b   : > { %3403 = vmatprep.mubr.msk.bf16.mxu0 %vm170_vm1, %v4336_v38 }
  0xa0   : > { %3250 = vmatmul.mubr.msk.bf16.gmra.mrb[16].mxu1 %vm170_vm1, %v4439_v46 }
  0xa1   : > { %3253 = vmatprep.mubr.msk.bf16.mxu1 %vm170_vm1, %v4443_v48 }
  0xa2   : > { %3404 = vmatmul.mubr.msk.bf16.vlgmr.msra.gmra.mrb[0].mxu0 %vm170_vm1, %v4340_v29 }
  0xa3   : > { %3436 = vmatpush3.bf16.msra.mxu0 %v2215_v16  ;;  %3407 = vmatprep.mubr.msk.bf16.mxu0 %vm170_vm1, %v4379_v24 }
  0xa4   : > { %3770 = vmatprep.subr.msk.bf16.mxu0 %vm621_vm0, %v2940_v62 }
  0xa8   : > { %3254 = vmatmul.mubr.msk.bf16.gmra.mrb[20].mxu1 %vm170_vm1, %v4447_v23 }
  0xa9   : > { %3257 = vmatprep.mubr.msk.bf16.mxu1 %vm170_vm1, %v4455_v30 }
  0xaa   : > { %3408 = vmatmul.mubr.msk.bf16.gmra.mrb[4].mxu0 %vm170_vm1, %v4383_v26 }
  0xab   : > { %3411 = vmatprep.mubr.msk.bf16.mxu0 %vm170_vm1, %v4404_v3 }
  0xb0   : > { %3258 = vmatmul.mubr.msk.bf16.gmra.mrb[24].mxu1 %vm170_vm1, %v4459_v57 }
  0xb1   : > { %3261 = vmatprep.mubr.msk.bf16.mxu1 %vm170_vm1, %v4463_v49 }
  0xb2   : > { %3412 = vmatmul.mubr.msk.bf16.gmra.mrb[8].mxu0 %vm170_vm1, %v4408_v56 }
  0xb3   : > { %3415 = vmatprep.mubr.msk.bf16.mxu0 %vm170_vm1, %v4427_v54 }
  0xb8   : > { %3262 = vmatmul.mubr.msk.bf16.gmra.mrb[28].mxu1 %vm170_vm1, %v4468_v42 }
  0xb9   : > { %3267 = vmatprep.mubr.msk.bf16.mxu1 %vm170_vm1, %v1111_v60  ;;  %v4681_v60 = vpack.c.bf16 %v372_v61, %v371_v19  ;;  %v5028_v19 = vld [vmem:[#allocation8_spill] sm:$0xff]  ;;  %v5029_v61 = vld [vmem:[#allocation9_spill] sm:$0xff] }
  0xba   : > { %3416 = vmatmul.mubr.msk.bf16.gmra.mrb[12].mxu0 %vm170_vm1, %v4439_v46 }
  0xbb   : > { %3419 = vmatprep.mubr.msk.bf16.mxu0 %vm170_vm1, %v4443_v48 }
  0xc0   : > { %3268 = vmatmul.mubr.msk.bf16.vlgmr.msra.gmra.mrb[0].mxu1 %vm170_vm1, %v4281_v6  ;;  %v5025_v6 = vld [vmem:[#allocation20_spill] sm:$0xff] }
  0xc1   : > { %3300 = vmatpush3.bf16.msra.mxu1 %v1380_v21  ;;  %3271 = vmatprep.mubr.msk.bf16.mxu1 %vm170_vm1, %v5023_v47 }
  0xc2   : > { %3420 = vmatmul.mubr.msk.bf16.gmra.mrb[16].mxu0 %vm170_vm1, %v4447_v23  ;;  %3766 = vmatprep.subr.msk.bf16.mxu1 %vm621_vm0, %v3813_v36 }
  0xc3   : > { %3423 = vmatprep.mubr.msk.bf16.mxu0 %vm170_vm1, %v4455_v30 }
  0xc8   : > { %3272 = vmatmul.mubr.msk.bf16.gmra.mrb[4].mxu1 %vm170_vm1, %v5024_v8 }
  0xc9   : > { %3275 = vmatprep.mubr.msk.bf16.mxu1 %vm170_vm1, %v5025_v6 }
  0xca   : > { %3424 = vmatmul.mubr.msk.bf16.gmra.mrb[20].mxu0 %vm170_vm1, %v4459_v57 }
  0xcb   : > { %3427 = vmatprep.mubr.msk.bf16.mxu0 %vm170_vm1, %v4463_v49 }
  0xd0   : > { %3276 = vmatmul.mubr.msk.bf16.gmra.mrb[8].mxu1 %vm170_vm1, %v5026_v39 }
  0xd1   : > { %3279 = vmatprep.mubr.msk.bf16.mxu1 %vm170_vm1, %v4488_v43 }
  0xd2   : > { %3428 = vmatmul.mubr.msk.bf16.gmra.mrb[24].mxu0 %vm170_vm1, %v4468_v42 }
  0xd3   : > { %3431 = vmatprep.mubr.msk.bf16.mxu0 %vm170_vm1, %v4681_v60 }
  0xd8   : > { %3280 = vmatmul.mubr.msk.bf16.gmra.mrb[12].mxu1 %vm170_vm1, %v4490_v22 }
  0xd9   : > { %3283 = vmatprep.mubr.msk.bf16.mxu1 %vm170_vm1, %v4514_v0 }
  0xda   : > { %3432 = vmatmul.mubr.msk.bf16.gmra.mrb[28].mxu0 %vm170_vm1, %v1996_v28 }
  0xdb   : > { %3437 = vmatprep.mubr.msk.bf16.mxu0 %vm170_vm1, %v5027_v37 }
  0xe0   : > { %3284 = vmatmul.mubr.msk.bf16.gmra.mrb[16].mxu1 %vm170_vm1, %v4516_v50 }
  0xe1   : > { %3287 = vmatprep.mubr.msk.bf16.mxu1 %vm170_vm1, %v4540_v17 }
  0xe2   : > { %3438 = vmatmul.mubr.msk.bf16.vlgmr.msra.gmra.mrb[0].mxu0 %vm170_vm1, %v5028_v19 }
  0xe3   : > { %3470 = vmatpush3.bf16.msra.mxu0 %v2424_v34  ;;  %3441 = vmatprep.mubr.msk.bf16.mxu0 %vm170_vm1, %v5029_v61 }
  0xe8   : > { %3288 = vmatmul.mubr.msk.bf16.gmra.mrb[20].mxu1 %vm170_vm1, %v4542_v18 }
  0xe9   : > { %3291 = vmatprep.mubr.msk.bf16.mxu1 %vm170_vm1, %v4569_v11 }
  0xea   : > { %3442 = vmatmul.mubr.msk.bf16.gmra.mrb[4].mxu0 %vm170_vm1, %v5030_v55 }
  0xeb   : > { %3445 = vmatprep.mubr.msk.bf16.mxu0 %vm170_vm1, %v5031_v53 }
  0xf0   : > { %3292 = vmatmul.mubr.msk.bf16.gmra.mrb[24].mxu1 %vm170_vm1, %v4571_v13 }
  0xf1   : > { %3295 = vmatprep.mubr.msk.bf16.mxu1 %vm170_vm1, %v4591_v51 }
  0xf2   : > { %3446 = vmatmul.mubr.msk.bf16.gmra.mrb[8].mxu0 %vm170_vm1, %v5032_v45 }
  0xf3   : > { %3449 = vmatprep.mubr.msk.bf16.mxu0 %vm170_vm1, %v5033_v41 }
  0xf8   : > { %3296 = vmatmul.mubr.msk.bf16.gmra.mrb[28].mxu1 %vm170_vm1, %v4593_v44 }
  0xf9   : > { %3301 = vmatprep.mubr.msk.bf16.mxu1 %vm170_vm1, %v4113_v10  ;;  %v2201_v10 = vrot.slane %v374_v4, 1 }
  0xfa   : > { %3450 = vmatmul.mubr.msk.bf16.gmra.mrb[12].mxu0 %vm170_vm1, %v5034_v58 }
  0xfb   : > { %3453 = vmatprep.mubr.msk.bf16.mxu0 %vm170_vm1, %v5035_v59 }
 0x100   : > { %3302 = vmatmul.mubr.msk.bf16.vlgmr.msra.gmra.mrb[0].mxu1 %vm170_vm1, %v4336_v38  ;;  %v2202_v38 = vrot.slane %v375_v14, 1 }
 0x101   : > { %3504 = vmatpush3.bf16.msra.mxu1 %v5036_v1  ;;  %3305 = vmatprep.mubr.msk.bf16.mxu1 %vm170_vm1, %v4340_v29  ;;  %v2204_v29 = vrot.slane %v376_v32, 1 }
 0x102   : > { %3454 = vmatmul.mubr.msk.bf16.gmra.mrb[16].mxu0 %vm170_vm1, %v5037_v2 }
 0x103   : > { %3457 = vmatprep.mubr.msk.bf16.mxu0 %vm170_vm1, %v5038_v27 }
 0x108   : > { %3306 = vmatmul.mubr.msk.bf16.gmra.mrb[4].mxu1 %vm170_vm1, %v4379_v24  ;;  %v2203_v24 = vsel %vm442_vm3, %v2201_v10, %v2202_v38 }
 0x109   : > { %3309 = vmatprep.mubr.msk.bf16.mxu1 %vm170_vm1, %v4383_v26  ;;  %v2205_v26 = vsel %vm442_vm3, %v2202_v38, %v2204_v29 }
 0x10a   : > { %3458 = vmatmul.mubr.msk.bf16.gmra.mrb[20].mxu0 %vm170_vm1, %v4410_v52  ;;  %v2208_v7 = vpack.c.bf16 %v2205_v26, %v2203_v24 }
 0x10b   : > { %3461 = vmatprep.mubr.msk.bf16.mxu0 %vm170_vm1, %v4482_v15 }
 0x110   : > { %3310 = vmatmul.mubr.msk.bf16.gmra.mrb[8].mxu1 %vm170_vm1, %v4404_v3 }
 0x111   : > { %3313 = vmatprep.mubr.msk.bf16.mxu1 %vm170_vm1, %v4408_v56 }
 0x112   : > { %3462 = vmatmul.mubr.msk.bf16.gmra.mrb[24].mxu0 %vm170_vm1, %v4510_v25 }
 0x113   : > { %3465 = vmatprep.mubr.msk.bf16.mxu0 %vm170_vm1, %v4609_v9 }
 0x118   : > { %3314 = vmatmul.mubr.msk.bf16.gmra.mrb[12].mxu1 %vm170_vm1, %v4427_v54 }
 0x119   : > { %3317 = vmatprep.mubr.msk.bf16.mxu1 %vm170_vm1, %v4439_v46 }
 0x11a   : > { %3466 = vmatmul.mubr.msk.bf16.gmra.mrb[28].mxu0 %vm170_vm1, %v2208_v7 }
 0x11b   : > { %3471 = vmatprep.mubr.msk.bf16.mxu0 %vm170_vm1, %v5023_v47 }
 0x120   : > { %3318 = vmatmul.mubr.msk.bf16.gmra.mrb[16].mxu1 %vm170_vm1, %v4443_v48 }
 0x121   : > { %3321 = vmatprep.mubr.msk.bf16.mxu1 %vm170_vm1, %v4447_v23 }
 0x122   : > { %3472 = vmatmul.mubr.msk.bf16.vlgmr.msra.gmra.mrb[0].mxu0 %vm170_vm1, %v5024_v8 }
 0x123   : > { %3475 = vmatprep.mubr.msk.bf16.mxu0 %vm170_vm1, %v5025_v6 }
 0x128   : > { %3322 = vmatmul.mubr.msk.bf16.gmra.mrb[20].mxu1 %vm170_vm1, %v4455_v30 }
 0x129   : > { %3325 = vmatprep.mubr.msk.bf16.mxu1 %vm170_vm1, %v4459_v57 }
 0x12a   : > { %3476 = vmatmul.mubr.msk.bf16.gmra.mrb[4].mxu0 %vm170_vm1, %v5026_v39 }
 0x12b   : > { %3479 = vmatprep.mubr.msk.bf16.mxu0 %vm170_vm1, %v4488_v43 }
 0x130   : > { %3326 = vmatmul.mubr.msk.bf16.gmra.mrb[24].mxu1 %vm170_vm1, %v4463_v49 }
 0x131   : > { %3329 = vmatprep.mubr.msk.bf16.mxu1 %vm170_vm1, %v4468_v42 }
 0x132   : > { %3480 = vmatmul.mubr.msk.bf16.gmra.mrb[8].mxu0 %vm170_vm1, %v4490_v22 }
 0x133   : > { %3483 = vmatprep.mubr.msk.bf16.mxu0 %vm170_vm1, %v4514_v0 }
 0x138   : > { %3330 = vmatmul.mubr.msk.bf16.gmra.mrb[28].mxu1 %vm170_vm1, %v4681_v60 }
 0x139   : > { %3351 = vmatprep.mubr.msk.bf16.mxu1 %vm170_vm1, %v5034_v58 }
 0x13a   : > { %3484 = vmatmul.mubr.msk.bf16.gmra.mrb[12].mxu0 %vm170_vm1, %v4516_v50 }
 0x13b   : > { %3487 = vmatprep.mubr.msk.bf16.mxu0 %vm170_vm1, %v4540_v17  ;;  %v4847_v17 = vld [vmem:[%s4975_s2] ss:$0 sm:$0xff] }
 0x140   : > { %3352 = vmatmul.mubr.msk.bf16.vlgmr.msra.gmra.mrb[16].mxu1 %vm170_vm1, %v5035_v59 }
 0x141   : > { %3355 = vmatprep.mubr.msk.bf16.mxu1 %vm170_vm1, %v5037_v2 }
 0x142   : > { %3488 = vmatmul.mubr.msk.bf16.gmra.mrb[16].mxu0 %vm170_vm1, %v4542_v18 }
 0x143   : > { %3491 = vmatprep.mubr.msk.bf16.mxu0 %vm170_vm1, %v4569_v11 }
 0x148   : > { %3356 = vmatmul.mubr.msk.bf16.gmra.mrb[20].mxu1 %vm170_vm1, %v5038_v27 }
 0x149   : > { %3359 = vmatprep.mubr.msk.bf16.mxu1 %vm170_vm1, %v4410_v52 }
 0x14a   : > { %3492 = vmatmul.mubr.msk.bf16.gmra.mrb[20].mxu0 %vm170_vm1, %v4571_v13 }
 0x14b   : > { %3495 = vmatprep.mubr.msk.bf16.mxu0 %vm170_vm1, %v4591_v51 }
 0x150   : > { %3360 = vmatmul.mubr.msk.bf16.gmra.mrb[24].mxu1 %vm170_vm1, %v4482_v15 }
 0x151   : > { %3363 = vmatprep.mubr.msk.bf16.mxu1 %vm170_vm1, %v4510_v25 }
 0x152   : > { %3496 = vmatmul.mubr.msk.bf16.gmra.mrb[24].mxu0 %vm170_vm1, %v4593_v44 }
 0x153   : > { %3499 = vmatprep.mubr.msk.bf16.mxu0 %vm170_vm1, %v4605_v12 }
 0x158   : > { %3364 = vmatmul.mubr.msk.bf16.gmra.mrb[28].mxu1 %vm170_vm1, %v4609_v9 }
 0x15a   : > { %3500 = vmatmul.mubr.msk.bf16.gmra.mrb[28].mxu0 %vm170_vm1, %v2417_v31 }
 0x1d3   : > { %v3303_v22 = vpop.f32.mrb[0].mxu1 }
 0x1d4   : > { %v1416_v43 = vpop.f32.mrb[1].mxu1 }
 0x1d5   : > { %v3304_v42 = vpop.f32.mrb[2].mxu1 }
 0x1d6   : > { %v1419_v3 = vpop.f32.mrb[3].mxu1 }
 0x1db   : > { %v3307_v56 = vpop.f32.mrb[4].mxu1 }
 0x1dc   : > { %v1432_v52 = vpop.f32.mrb[5].mxu1 }
 0x1dd   : > { %v3308_v15 = vpop.f32.mrb[6].mxu1 }
 0x1de   : > { %v1435_v54 = vpop.f32.mrb[7].mxu1 }
 0x1e3   : > { %v3311_v46 = vpop.f32.mrb[8].mxu1 }
 0x1e4   : > { %v1448_v48 = vpop.f32.mrb[9].mxu1 }
 0x1e5   : > { %v3312_v23 = vpop.f32.mrb[10].mxu1 }
 0x1e6   : > { %v1451_v30 = vpop.f32.mrb[11].mxu1 }
 0x1eb   : > { %v4835_v57 = vpop.f32.mrb[12].mxu1 }
 0x1ec   : > { %v4837_v49 = vpop.f32.mrb[13].mxu1 }
 0x1ed   : > { %v4839_v25 = vpop.f32.mrb[14].mxu1 }
 0x1ee   : > { %v4841_v0 = vpop.f32.mrb[15].mxu1 }
 0x1f5   : > { %v3473_v50 = vpop.f32.mrb[0].mxu0 }
 0x1f6   : > { %v3505_v18 = vadd.f32 %v3473_v50, %v3303_v22  ;;  %v2460_v11 = vpop.f32.mrb[1].mxu0 }
 0x1f7   : > { %v3506_v13 = vadd.f32 %v2460_v11, %v1416_v43  ;;  %v3474_v51 = vpop.f32.mrb[2].mxu0 }
 0x1f8   : > { %v2628_v44 = vadd.f32 %v3505_v18, %v4847_v17  ;;  %v3507_v12 = vadd.f32 %v3474_v51, %v3304_v42  ;;  %v2463_v40 = vpop.f32.mrb[3].mxu0 }
 0x1f9   : > { %v2626_v9 = vadd.f32 %v3506_v13, %v4847_v17  ;;  %v3508_v16 = vadd.f32 %v2463_v40, %v1419_v3 }
 0x1fa   : > { %v2660_v62 = vmax.f32 %v2628_v44, 0.0  ;;  %v2629_v21 = vadd.f32 %v3507_v12, %v4847_v17 }
 0x1fb   : > { %v2658_v47 = vmax.f32 %v2626_v9, 0.0  ;;  %v2627_v36 = vadd.f32 %v3508_v16, %v4847_v17 }
 0x1fc   : > { %2692 = vst [vmem:[%s4855_s8 + $0x10] sm:$0xff] %v2660_v62  ;;  %v2661_v8 = vmax.f32 %v2629_v21, 0.0 }
 0x1fd   : > { %2690 = vst [vmem:[%s4855_s8] sm:$0xff] %v2658_v47  ;;  %v2659_v6 = vmax.f32 %v2627_v36, 0.0  ;;  %v3477_v60 = vpop.f32.mrb[4].mxu0 }
 0x1fe   : > { %2693 = vst [vmem:[%s4855_s8 + $0x18] sm:$0xff] %v2661_v8  ;;  %v3509_v39 = vadd.f32 %v3477_v60, %v3307_v56  ;;  %v2476_v4 = vpop.f32.mrb[5].mxu0 }
 0x1ff   : > { %2691 = vst [vmem:[%s4855_s8 + $0x8] sm:$0xff] %v2659_v6  ;;  %v3510_v14 = vadd.f32 %v2476_v4, %v1432_v52  ;;  %v3478_v20 = vpop.f32.mrb[6].mxu0 }
 0x200   : > { %v2632_v5 = vadd.f32 %v3509_v39, %v4847_v17  ;;  %v3511_v32 = vadd.f32 %v3478_v20, %v3308_v15  ;;  %v2479_v33 = vpop.f32.mrb[7].mxu0 }
 0x201   : > { %v2630_v28 = vadd.f32 %v3510_v14, %v4847_v17  ;;  %v3512_v35 = vadd.f32 %v2479_v33, %v1435_v54 }
 0x202   : > { %v2664_v63 = vmax.f32 %v2632_v5, 0.0  ;;  %v2633_v31 = vadd.f32 %v3511_v32, %v4847_v17 }
 0x203   : > { %v2662_v37 = vmax.f32 %v2630_v28, 0.0  ;;  %v2631_v34 = vadd.f32 %v3512_v35, %v4847_v17 }
 0x204   : > { %2696 = vst [vmem:[%s4855_s8 + $0x30] sm:$0xff] %v2664_v63  ;;  %v2665_v19 = vmax.f32 %v2633_v31, 0.0 }
 0x205   : > { %2694 = vst [vmem:[%s4855_s8 + $0x20] sm:$0xff] %v2662_v37  ;;  %v2663_v61 = vmax.f32 %v2631_v34, 0.0  ;;  %v3481_v55 = vpop.f32.mrb[8].mxu0 }
 0x206   : > { %2697 = vst [vmem:[%s4855_s8 + $0x38] sm:$0xff] %v2665_v19  ;;  %v3513_v53 = vadd.f32 %v3481_v55, %v3311_v46  ;;  %v2492_v45 = vpop.f32.mrb[9].mxu0 }
 0x207   : > { %2695 = vst [vmem:[%s4855_s8 + $0x28] sm:$0xff] %v2663_v61  ;;  %v3514_v41 = vadd.f32 %v2492_v45, %v1448_v48  ;;  %v3482_v58 = vpop.f32.mrb[10].mxu0 }
 0x208   : > { %v2636_v59 = vadd.f32 %v3513_v53, %v4847_v17  ;;  %v3515_v1 = vadd.f32 %v3482_v58, %v3312_v23  ;;  %v2495_v2 = vpop.f32.mrb[11].mxu0 }
 0x209   : > { %v2634_v27 = vadd.f32 %v3514_v41, %v4847_v17  ;;  %v3516_v10 = vadd.f32 %v2495_v2, %v1451_v30 }
 0x20a   : > { %v2668_v38 = vmax.f32 %v2636_v59, 0.0  ;;  %v2637_v29 = vadd.f32 %v3515_v1, %v4847_v17 }
 0x20b   : > { %v2666_v24 = vmax.f32 %v2634_v27, 0.0  ;;  %v2635_v26 = vadd.f32 %v3516_v10, %v4847_v17 }
 0x20c   : > { %2700 = vst [vmem:[%s4855_s8 + $0x50] sm:$0xff] %v2668_v38  ;;  %v2669_v7 = vmax.f32 %v2637_v29, 0.0 }
 0x20d   : > { %2698 = vst [vmem:[%s4855_s8 + $0x40] sm:$0xff] %v2666_v24  ;;  %v2667_v22 = vmax.f32 %v2635_v26, 0.0  ;;  %v3485_v43 = vpop.f32.mrb[12].mxu0 }
 0x20e   : > { %2701 = vst [vmem:[%s4855_s8 + $0x58] sm:$0xff] %v2669_v7  ;;  %v3517_v42 = vadd.f32 %v3485_v43, %v4835_v57  ;;  %v2508_v3 = vpop.f32.mrb[13].mxu0 }
 0x20f   : > { %2699 = vst [vmem:[%s4855_s8 + $0x48] sm:$0xff] %v2667_v22  ;;  %v3518_v56 = vadd.f32 %v2508_v3, %v4837_v49  ;;  %v3486_v52 = vpop.f32.mrb[14].mxu0 }
 0x210   : > { %v2640_v15 = vadd.f32 %v3517_v42, %v4847_v17  ;;  %v3519_v54 = vadd.f32 %v3486_v52, %v4839_v25  ;;  %v2511_v46 = vpop.f32.mrb[15].mxu0 }
 0x211   : > { %v2638_v48 = vadd.f32 %v3518_v56, %v4847_v17  ;;  %v3520_v23 = vadd.f32 %v2511_v46, %v4841_v0 }
 0x212   : > { %v2672_v30 = vmax.f32 %v2640_v15, 0.0  ;;  %v2641_v57 = vadd.f32 %v3519_v54, %v4847_v17 }
 0x213   : > { %v2670_v50 = vmax.f32 %v2638_v48, 0.0  ;;  %v2639_v18 = vadd.f32 %v3520_v23, %v4847_v17  ;;  %v3353_v11 = vpop.f32.mrb[16].mxu1 }
 0x214   : > { %2704 = vst [vmem:[%s4855_s8 + $0x70] sm:$0xff] %v2672_v30  ;;  %v2673_v49 = vmax.f32 %v2641_v57, 0.0  ;;  %v1692_v13 = vpop.f32.mrb[17].mxu1 }
 0x215   : > { %2702 = vst [vmem:[%s4855_s8 + $0x60] sm:$0xff] %v2670_v50  ;;  %v2671_v51 = vmax.f32 %v2639_v18, 0.0  ;;  %v3489_v25 = vpop.f32.mrb[16].mxu0  ;;  %v3354_v44 = vpop.f32.mrb[18].mxu1 }
 0x216   : > { %2705 = vst [vmem:[%s4855_s8 + $0x78] sm:$0xff] %v2673_v49  ;;  %v3521_v12 = vadd.f32 %v3489_v25, %v3353_v11  ;;  %v2524_v40 = vpop.f32.mrb[17].mxu0  ;;  %v1695_v0 = vpop.f32.mrb[19].mxu1 }
 0x217   : > { %2703 = vst [vmem:[%s4855_s8 + $0x68] sm:$0xff] %v2671_v51  ;;  %v3522_v9 = vadd.f32 %v2524_v40, %v1692_v13  ;;  %v3490_v16 = vpop.f32.mrb[18].mxu0 }
 0x218   : > { %v2644_v62 = vadd.f32 %v3521_v12, %v4847_v17  ;;  %v3523_v21 = vadd.f32 %v3490_v16, %v3354_v44  ;;  %v2527_v47 = vpop.f32.mrb[19].mxu0 }
 0x219   : > { %v2642_v36 = vadd.f32 %v3522_v9, %v4847_v17  ;;  %v3524_v8 = vadd.f32 %v2527_v47, %v1695_v0 }
 0x21a   : > { %v2676_v6 = vmax.f32 %v2644_v62, 0.0  ;;  %v2645_v60 = vadd.f32 %v3523_v21, %v4847_v17 }
 0x21b   : > { %v2674_v39 = vmax.f32 %v2642_v36, 0.0  ;;  %v2643_v4 = vadd.f32 %v3524_v8, %v4847_v17  ;;  %v3357_v14 = vpop.f32.mrb[20].mxu1 }
 0x21c   : > { %2708 = vst [vmem:[%s4855_s8 + $0x90] sm:$0xff] %v2676_v6  ;;  %v2677_v20 = vmax.f32 %v2645_v60, 0.0  ;;  %v1708_v5 = vpop.f32.mrb[21].mxu1 }
 0x21d   : > { %2706 = vst [vmem:[%s4855_s8 + $0x80] sm:$0xff] %v2674_v39  ;;  %v2675_v32 = vmax.f32 %v2643_v4, 0.0  ;;  %v3493_v33 = vpop.f32.mrb[20].mxu0  ;;  %v3358_v28 = vpop.f32.mrb[22].mxu1 }
 0x21e   : > { %2709 = vst [vmem:[%s4855_s8 + $0x98] sm:$0xff] %v2677_v20  ;;  %v3525_v35 = vadd.f32 %v3493_v33, %v3357_v14  ;;  %v2540_v63 = vpop.f32.mrb[21].mxu0  ;;  %v1711_v31 = vpop.f32.mrb[23].mxu1 }
 0x21f   : > { %2707 = vst [vmem:[%s4855_s8 + $0x88] sm:$0xff] %v2675_v32  ;;  %v3526_v37 = vadd.f32 %v2540_v63, %v1708_v5  ;;  %v3494_v34 = vpop.f32.mrb[22].mxu0 }
 0x220   : > { %v2648_v19 = vadd.f32 %v3525_v35, %v4847_v17  ;;  %v3527_v61 = vadd.f32 %v3494_v34, %v3358_v28  ;;  %v2543_v55 = vpop.f32.mrb[23].mxu0 }
 0x221   : > { %v2646_v53 = vadd.f32 %v3526_v37, %v4847_v17  ;;  %v3528_v45 = vadd.f32 %v2543_v55, %v1711_v31 }
 0x222   : > { %v2680_v41 = vmax.f32 %v2648_v19, 0.0  ;;  %v2649_v58 = vadd.f32 %v3527_v61, %v4847_v17 }
 0x223   : > { %v2678_v59 = vmax.f32 %v2646_v53, 0.0  ;;  %v2647_v1 = vadd.f32 %v3528_v45, %v4847_v17  ;;  %v3361_v2 = vpop.f32.mrb[24].mxu1 }
 0x224   : > { %2712 = vst [vmem:[%s4855_s8 + $0xb0] sm:$0xff] %v2680_v41  ;;  %v2681_v27 = vmax.f32 %v2649_v58, 0.0  ;;  %v1724_v10 = vpop.f32.mrb[25].mxu1 }
 0x225   : > { %2710 = vst [vmem:[%s4855_s8 + $0xa0] sm:$0xff] %v2678_v59  ;;  %v2679_v38 = vmax.f32 %v2647_v1, 0.0  ;;  %v3497_v29 = vpop.f32.mrb[24].mxu0  ;;  %v3362_v24 = vpop.f32.mrb[26].mxu1 }
 0x226   : > { %2713 = vst [vmem:[%s4855_s8 + $0xb8] sm:$0xff] %v2681_v27  ;;  %v3529_v26 = vadd.f32 %v3497_v29, %v3361_v2  ;;  %v2556_v7 = vpop.f32.mrb[25].mxu0  ;;  %v1727_v22 = vpop.f32.mrb[27].mxu1 }
 0x227   : > { %2711 = vst [vmem:[%s4855_s8 + $0xa8] sm:$0xff] %v2679_v38  ;;  %v3530_v43 = vadd.f32 %v2556_v7, %v1724_v10  ;;  %v3498_v42 = vpop.f32.mrb[26].mxu0 }
 0x228   : > { %v2652_v3 = vadd.f32 %v3529_v26, %v4847_v17  ;;  %v3531_v56 = vadd.f32 %v3498_v42, %v3362_v24  ;;  %v2559_v52 = vpop.f32.mrb[27].mxu0 }
 0x229   : > { %v2650_v15 = vadd.f32 %v3530_v43, %v4847_v17  ;;  %v3532_v54 = vadd.f32 %v2559_v52, %v1727_v22 }
 0x22a   : > { %v2684_v46 = vmax.f32 %v2652_v3, 0.0  ;;  %v2653_v48 = vadd.f32 %v3531_v56, %v4847_v17 }
 0x22b   : > { %v2682_v23 = vmax.f32 %v2650_v15, 0.0  ;;  %v2651_v30 = vadd.f32 %v3532_v54, %v4847_v17  ;;  %v3365_v57 = vpop.f32.mrb[28].mxu1 }
 0x22c   : > { %2716 = vst [vmem:[%s4855_s8 + $0xd0] sm:$0xff] %v2684_v46  ;;  %v2685_v50 = vmax.f32 %v2653_v48, 0.0  ;;  %v1740_v18 = vpop.f32.mrb[29].mxu1 }
 0x22d   : > { %2714 = vst [vmem:[%s4855_s8 + $0xc0] sm:$0xff] %v2682_v23  ;;  %v2683_v11 = vmax.f32 %v2651_v30, 0.0  ;;  %v3501_v49 = vpop.f32.mrb[28].mxu0  ;;  %v3366_v13 = vpop.f32.mrb[30].mxu1 }
 0x22e   : > { %2717 = vst [vmem:[%s4855_s8 + $0xd8] sm:$0xff] %v2685_v50  ;;  %v3533_v51 = vadd.f32 %v3501_v49, %v3365_v57  ;;  %v2572_v25 = vpop.f32.mrb[29].mxu0  ;;  %v1743_v44 = vpop.f32.mrb[31].mxu1 }
 0x22f   : > { %2715 = vst [vmem:[%s4855_s8 + $0xc8] sm:$0xff] %v2683_v11  ;;  %v3534_v12 = vadd.f32 %v2572_v25, %v1740_v18  ;;  %v3502_v40 = vpop.f32.mrb[30].mxu0 }
 0x230   : > { %v2656_v0 = vadd.f32 %v3533_v51, %v4847_v17  ;;  %v3535_v9 = vadd.f32 %v3502_v40, %v3366_v13  ;;  %v2575_v16 = vpop.f32.mrb[31].mxu0 }
 0x231   : > { %v2654_v62 = vadd.f32 %v3534_v12, %v4847_v17  ;;  %v3536_v21 = vadd.f32 %v2575_v16, %v1743_v44 }
 0x232   : > { %v2688_v47 = vmax.f32 %v2656_v0, 0.0  ;;  %v2657_v36 = vadd.f32 %v3535_v9, %v4847_v17 }
 0x233   : > { %v2686_v8 = vmax.f32 %v2654_v62, 0.0  ;;  %v2655_v6 = vadd.f32 %v3536_v21, %v4847_v17 }
 0x234   : > { %2720 = vst [vmem:[%s4855_s8 + $0xf0] sm:$0xff] %v2688_v47  ;;  %v2689_v60 = vmax.f32 %v2657_v36, 0.0 }
 0x235   : > { %2718 = vst [vmem:[%s4855_s8 + $0xe0] sm:$0xff] %v2686_v8  ;;  %v2687_v39 = vmax.f32 %v2655_v6, 0.0 }
 0x236   : > { %2721 = vst [vmem:[%s4855_s8 + $0xf8] sm:$0xff] %v2689_v60 }
 0x237   : > { %2719 = vst [vmem:[%s4855_s8 + $0xe8] sm:$0xff] %v2687_v39 }
 0x238   : > { %3827 = shalt.err (!%p3824_p3)
}
 0x239   : > { %s3828_s27 = scalar_lea.hbm %s4923_s19, 4096  ;;  %s3832_s30 = scalar_lea.hbm %s4976_s3, 8192 }
 0x23a   : > { %p3829_p4 = scmp.ne.s32.totalorder %s4923_s19, %s3828_s27  ;;  %p3833_p9 = scmp.lt.u32.totalorder %s4923_s19, %s4976_s3 }
 0x23b   : > { %p3834_p10 = scmp.lt.u32.totalorder %s3832_s30, %s3828_s27  ;;  %p3836_p12 = scmp.lt.u32.totalorder %s3828_s27, %s4923_s19 }
 0x23c   : > { %p3830_p7 = pnand %p3829_p4, %p3940_p5 }
 0x23d   : > { %p3835_p11 = por %p3834_p10, %p3833_p9 }
 0x23e   : > { %p3831_p8 = pneg %p3830_p7 }
 0x23f   : > { %p3837_p13 = por %p3836_p12, %p3835_p11 }
 0x241   : > { %p3838_p0 = pnand %p3837_p13, %p3831_p8 }
 0x243   : > { %3841 = shalt.err (!%p3838_p0)
}
 0x244   : > { %s3880_s6 = smov 128   ;;  %s3881_s7 = smov 8  }
 0x245   : > { %3771 = dma.vmem_to_hbm [thread:$0]  (%p3940_p5), %s4925_s10, 4096, %s4923_s19, %s4932_s16, %s3880_s6, %s3880_s6, %s3881_s7  }
 0x246 PF: > { %p3777_p1 = scmp.ge.s32.totalorder %s3876_s15, 2  ;;  %s2751_s8 = sand.u32 1, %s3864_s12  }
 0x247   : > { %s2752_s9 = scalar_lea.sflag [#allocation4], %s2751_s8 }
 0x248   : > { %p3774_p2 = pnand %p3777_p1, %p3944_p6 }
 0x24a   : > { %3859 = dma.done.wait (!%p3774_p2), %s2752_s9, 4096  }
 0x24b   : > { %3861 = vsyncadd (!%p3774_p2), %s2752_s9, 4294963200  ;;  %p13_p3 = scmp.ge.s32.totalorder %s3927_s18, 4   ;;  %s5039_s12 = smov %s3868_s13 }
 0x24c   : > { %s5040_s13 = smov %s3872_s14  ;;  %s5041_s14 = smov %s3938_s21 }
 0x24d   : > { %s5042_s15 = smov %s3927_s18  ;;  %15 = sbr.rel (!%p13_p3) target bundleno = 3 (0x3), region = 76 }
 0x254   :  { %2757 = vsyncpa [#allocation4], 1 }
 0x255   :  { %2759 = vsyncpa [#allocation4 + $0x1], 1 }

</bundles_post_ra>
